<compile_context>
chip_gen: v7x
topology: tpu7x:2x2x1
jax: 0.10.0
libtpu: 0.0.40
codegen_flags: <defaults>
</compile_context>

<pallas_src>
import functools

import jax
import jax.numpy as jnp
from jax.experimental import pallas as pl
from jax.experimental.pallas import tpu as pltpu

D_IN, D1, D2, D3, D_OUT = 1024, 512, 256, 128, 23
NOUT_PAD = 128  # last layer padded 23 -> 128 columns: lane-dense, unmasked stores


def _round_up(n, m):
    return ((n + m - 1) // m) * m


def _choose_tb(batch):
    """Pick the batch-tile size TB.

    * tiny batch: one 16-row-aligned tile (bf16 sublane packing).
    * moderate batch: >= 2 grid steps so both v7x TensorCores get work under the
      "parallel" batch axis (each core keeps its own ~1.4 MiB weight copy).
    * large batch: big tiles (multiple of 128 for the v5e MXU) to amortize the
      ~0.35us per-grid-step overhead; prefer a tile that divides the batch so
      no zero-padded copy of x has to be materialized.
    """
    if batch <= 16:
        return _round_up(max(batch, 1), 16)
    if batch <= 2048:
        return _round_up(pl.cdiv(batch, 2), 16)
    for tb in (1024, 512, 256):
        if batch % tb == 0:
            return tb
    return 512


def _mlp_kernel(x_ref,
                w1_ref, b1_ref,
                w2_ref, b2_ref,
                w3_ref, b3_ref,
                w4_ref, b4_ref,
                o_ref):
    """One batch tile of the fused MLP forward.

    x_ref : (TB, 1024) bf16
    wN_ref: (in, out)  bf16      bN_ref: (1, out) f32
    o_ref : (TB, 128)  f32       (columns 23..127 are zero padding)

    All matmuls run on the MXU in bf16 with f32 accumulation; bias + ReLU stay
    f32 on the VPU.  Dropout layers are identity in eval mode.
    """
    x = x_ref[...]

    h1 = jnp.dot(x, w1_ref[...], preferred_element_type=jnp.float32) + b1_ref[...]
    h1 = jnp.maximum(h1, 0.0).astype(jnp.bfloat16)
    # dropout1: identity at inference

    h2 = jnp.dot(h1, w2_ref[...], preferred_element_type=jnp.float32) + b2_ref[...]
    h2 = jnp.maximum(h2, 0.0).astype(jnp.bfloat16)
    # dropout2: identity at inference

    h3 = jnp.dot(h2, w3_ref[...], preferred_element_type=jnp.float32) + b3_ref[...]
    h3 = jnp.maximum(h3, 0.0).astype(jnp.bfloat16)
    # dropout3: identity at inference

    o_ref[...] = (jnp.dot(h3, w4_ref[...], preferred_element_type=jnp.float32)
                  + b4_ref[...])


def pack_params(params):
    """One-time conversion of f32 Linear params into the kernel-ready layout.

    Call this ONCE, outside the per-call forward path: casts weights to bf16
    and pads the last layer from 23 to 128 output columns (pad columns are
    exactly zero -> padded output columns are exactly zero).
    """
    (w1, b1), (w2, b2), (w3, b3), (w4, b4) = params
    w4p = jnp.zeros((D3, NOUT_PAD), jnp.bfloat16).at[:, :D_OUT].set(
        w4.astype(jnp.bfloat16))
    b4p = jnp.zeros((1, NOUT_PAD), jnp.float32).at[:, :D_OUT].set(
        b4.astype(jnp.float32).reshape(1, -1))
    return (
        w1.astype(jnp.bfloat16), b1.astype(jnp.float32).reshape(1, -1),
        w2.astype(jnp.bfloat16), b2.astype(jnp.float32).reshape(1, -1),
        w3.astype(jnp.bfloat16), b3.astype(jnp.float32).reshape(1, -1),
        w4p, b4p,
    )


@functools.partial(jax.jit, static_argnames=("padded_output",))
def network_forward(x_nchw, packed_params, padded_output=False):
    """(B, 1, 32, 32) f32 -> (B, 23) f32   (or (B_pad, 128) if padded_output)."""
    B = x_nchw.shape[0]
    x = x_nchw.reshape(B, D_IN).astype(jnp.bfloat16)  # row-major == torch.flatten

    TB = _choose_tb(B)
    B_pad = _round_up(B, TB)
    if B_pad != B:
        # Only pad when TB does not divide B; the bf16 cast above fuses into
        # this single update, so x is not copied twice.
        x = jnp.zeros((B_pad, D_IN), jnp.bfloat16).at[:B].set(x)

    grid = (B_pad // TB,)

    in_specs = [
        pl.BlockSpec((TB, D_IN), lambda i: (i, 0)),        # x tile, walks the batch
        pl.BlockSpec((D_IN, D1), lambda i: (0, 0)),        # w1 (VMEM-resident)
        pl.BlockSpec((1, D1), lambda i: (0, 0)),           # b1
        pl.BlockSpec((D1, D2), lambda i: (0, 0)),          # w2
        pl.BlockSpec((1, D2), lambda i: (0, 0)),           # b2
        pl.BlockSpec((D2, D3), lambda i: (0, 0)),          # w3
        pl.BlockSpec((1, D3), lambda i: (0, 0)),           # b3
        pl.BlockSpec((D3, NOUT_PAD), lambda i: (0, 0)),    # w4 (padded)
        pl.BlockSpec((1, NOUT_PAD), lambda i: (0, 0)),     # b4 (padded)
    ]
    out_spec = pl.BlockSpec((TB, NOUT_PAD), lambda i: (i, 0))

    flops = 2 * B_pad * (D_IN * D1 + D1 * D2 + D2 * D3 + D3 * NOUT_PAD)
    weight_bytes = 2 * (D_IN * D1 + D1 * D2 + D2 * D3 + D3 * NOUT_PAD)   # bf16
    bias_bytes = 4 * (D1 + D2 + D3 + NOUT_PAD)                           # f32
    bytes_accessed = (weight_bytes + bias_bytes
                      + B_pad * D_IN * 2 + B_pad * NOUT_PAD * 4)

    out_pad = pl.pallas_call(
        _mlp_kernel,
        out_shape=jax.ShapeDtypeStruct((B_pad, NOUT_PAD), jnp.float32),
        grid=grid,
        in_specs=in_specs,
        out_specs=out_spec,
        compiler_params=pltpu.CompilerParams(
            dimension_semantics=("parallel",),
            vmem_limit_bytes=32 * 1024 * 1024),
        cost_estimate=pl.CostEstimate(
            flops=flops, transcendentals=0, bytes_accessed=bytes_accessed),
    )(x, *packed_params)

    if padded_output:
        # Lane-dense padded block; consumer slices [:B, :23] lazily and skips
        # the extra (B, 23) HBM pass below.
        return out_pad
    return out_pad[:B, :D_OUT]


def init_params(key):
    """Deterministic init mirroring PyTorch nn.Linear default (uniform +-1/sqrt(fan_in)).

    Weights stored as (in_features, out_features).
    """
    dims = [(D_IN, D1), (D1, D2), (D2, D3), (D3, D_OUT)]
    params = []
    for (fan_in, fan_out) in dims:
        key, kw, kb = jax.random.split(key, 3)
        bound = 1.0 / (fan_in ** 0.5)
        w = jax.random.uniform(kw, (fan_in, fan_out), jnp.float32, -bound, bound)
        b = jax.random.uniform(kb, (fan_out,), jnp.float32, -bound, bound)
        params.append((w, b))
    return params


if __name__ == "__main__":
    key = jax.random.PRNGKey(0)
    key, kx1, kx2 = jax.random.split(key, 3)

    params = init_params(key)
    packed = pack_params(params)            # one-time, outside the forward path

    def bf16_ref(xin):                      # same quantization as the kernel
        h = xin.reshape(xin.shape[0], -1).astype(jnp.bfloat16)
        for i, (w, b) in enumerate(params):
            h = jnp.dot(h, w.astype(jnp.bfloat16),
                        preferred_element_type=jnp.float32) + b
            if i < 3:
                h = jnp.maximum(h, 0.0).astype(jnp.bfloat16)
        return h

    def f32_ref(xin):                       # the original module's pure-f32 math
        h = xin.reshape(xin.shape[0], -1)
        for i, (w, b) in enumerate(params):
            h = h @ w + b
            if i < 3:
                h = jnp.maximum(h, 0.0)
        return h

    # Small batch (single tile) and a moderate batch exercising the
    # multi-tile + remainder-padding path.
    for kx, B in ((kx1, 2), (kx2, 48)):
        x = jax.random.uniform(kx, (B, 1, 32, 32), jnp.float32)
        out = network_forward(x, packed)
        jax.block_until_ready(out)
        assert out.shape == (B, 23) and out.dtype == jnp.float32

        ref = bf16_ref(x)
        assert jnp.allclose(out, ref, atol=2e-2, rtol=2e-2), \
            f"B={B}: max abs err {jnp.max(jnp.abs(out - ref))}"
        # Loose sanity check against the pure-f32 math of the original module.
        assert jnp.allclose(out, f32_ref(x), atol=0.1, rtol=0.1)

    print("KERNEL_OK")
</pallas_src>

<mosaic_0001>
module attributes {stable_mosaic.version = 11 : i64} {
  func.func @_mlp_kernel(%arg0: i32, %arg1: memref<16x1024xbf16, #tpu.memory_space<vmem>>, %arg2: memref<1024x512xbf16, #tpu.memory_space<vmem>>, %arg3: memref<1x512xf32, #tpu.memory_space<vmem>>, %arg4: memref<512x256xbf16, #tpu.memory_space<vmem>>, %arg5: memref<1x256xf32, #tpu.memory_space<vmem>>, %arg6: memref<256x128xbf16, #tpu.memory_space<vmem>>, %arg7: memref<1x128xf32, #tpu.memory_space<vmem>>, %arg8: memref<128x128xbf16, #tpu.memory_space<vmem>>, %arg9: memref<1x128xf32, #tpu.memory_space<vmem>>, %arg10: memref<16x128xf32, #tpu.memory_space<vmem>>) attributes {dimension_semantics = [#tpu.dimension_semantics<parallel>], iteration_bounds = array<i64: 1>, scalar_prefetch = 0 : i64, scratch_operands = 0 : i64, tpu.core_type = #tpu.core_type<tc>, window_params = [{transform_indices = @transform_0, window_bounds = array<i64: 16, 1024>}, {pipeline_mode = #tpu.pipeline_mode<synchronous>, transform_indices = @transform_1, window_bounds = array<i64: 1024, 512>}, {pipeline_mode = #tpu.pipeline_mode<synchronous>, transform_indices = @transform_2, window_bounds = array<i64: 1, 512>}, {pipeline_mode = #tpu.pipeline_mode<synchronous>, transform_indices = @transform_3, window_bounds = array<i64: 512, 256>}, {pipeline_mode = #tpu.pipeline_mode<synchronous>, transform_indices = @transform_4, window_bounds = array<i64: 1, 256>}, {pipeline_mode = #tpu.pipeline_mode<synchronous>, transform_indices = @transform_5, window_bounds = array<i64: 256, 128>}, {pipeline_mode = #tpu.pipeline_mode<synchronous>, transform_indices = @transform_6, window_bounds = array<i64: 1, 128>}, {pipeline_mode = #tpu.pipeline_mode<synchronous>, transform_indices = @transform_7, window_bounds = array<i64: 128, 128>}, {pipeline_mode = #tpu.pipeline_mode<synchronous>, transform_indices = @transform_8, window_bounds = array<i64: 1, 128>}, {transform_indices = @transform_9, window_bounds = array<i64: 16, 128>}]} {
    %c0 = arith.constant 0 : index
    %c0_0 = arith.constant 0 : index
    %0 = vector.load %arg1[%c0, %c0_0] : memref<16x1024xbf16, #tpu.memory_space<vmem>>, vector<16x1024xbf16>
    %c0_1 = arith.constant 0 : index
    %c0_2 = arith.constant 0 : index
    %1 = vector.load %arg2[%c0_1, %c0_2] : memref<1024x512xbf16, #tpu.memory_space<vmem>>, vector<1024x512xbf16>
    %cst = arith.constant dense<0.000000e+00> : vector<16x512xf32>
    %2 = tpu.matmul %0, %1, %cst {dimension_numbers = #tpu.dot_dimension_numbers<[1], [0], [0], [1], [0, 0, 1, 1], [], []>} : vector<16x1024xbf16>, vector<1024x512xbf16>, vector<16x512xf32> -> vector<16x512xf32>
    %c0_3 = arith.constant 0 : index
    %c0_4 = arith.constant 0 : index
    %3 = vector.load %arg3[%c0_3, %c0_4] : memref<1x512xf32, #tpu.memory_space<vmem>>, vector<1x512xf32>
    %4 = vector.broadcast %3 : vector<1x512xf32> to vector<16x512xf32>
    %5 = arith.addf %2, %4 : vector<16x512xf32>
    %cst_5 = arith.constant 0.000000e+00 : f32
    %6 = vector.broadcast %cst_5 : f32 to vector<16x512xf32>
    %7 = arith.maximumf %5, %6 : vector<16x512xf32>
    %8 = arith.truncf %7 : vector<16x512xf32> to vector<16x512xbf16>
    %c0_6 = arith.constant 0 : index
    %c0_7 = arith.constant 0 : index
    %9 = vector.load %arg4[%c0_6, %c0_7] : memref<512x256xbf16, #tpu.memory_space<vmem>>, vector<512x256xbf16>
    %cst_8 = arith.constant dense<0.000000e+00> : vector<16x256xf32>
    %10 = tpu.matmul %8, %9, %cst_8 {dimension_numbers = #tpu.dot_dimension_numbers<[1], [0], [0], [1], [0, 0, 1, 1], [], []>} : vector<16x512xbf16>, vector<512x256xbf16>, vector<16x256xf32> -> vector<16x256xf32>
    %c0_9 = arith.constant 0 : index
    %c0_10 = arith.constant 0 : index
    %11 = vector.load %arg5[%c0_9, %c0_10] : memref<1x256xf32, #tpu.memory_space<vmem>>, vector<1x256xf32>
    %12 = vector.broadcast %11 : vector<1x256xf32> to vector<16x256xf32>
    %13 = arith.addf %10, %12 : vector<16x256xf32>
    %cst_11 = arith.constant 0.000000e+00 : f32
    %14 = vector.broadcast %cst_11 : f32 to vector<16x256xf32>
    %15 = arith.maximumf %13, %14 : vector<16x256xf32>
    %16 = arith.truncf %15 : vector<16x256xf32> to vector<16x256xbf16>
    %c0_12 = arith.constant 0 : index
    %c0_13 = arith.constant 0 : index
    %17 = vector.load %arg6[%c0_12, %c0_13] : memref<256x128xbf16, #tpu.memory_space<vmem>>, vector<256x128xbf16>
    %cst_14 = arith.constant dense<0.000000e+00> : vector<16x128xf32>
    %18 = tpu.matmul %16, %17, %cst_14 {dimension_numbers = #tpu.dot_dimension_numbers<[1], [0], [0], [1], [0, 0, 1, 1], [], []>} : vector<16x256xbf16>, vector<256x128xbf16>, vector<16x128xf32> -> vector<16x128xf32>
    %c0_15 = arith.constant 0 : index
    %c0_16 = arith.constant 0 : index
    %19 = vector.load %arg7[%c0_15, %c0_16] : memref<1x128xf32, #tpu.memory_space<vmem>>, vector<1x128xf32>
    %20 = vector.broadcast %19 : vector<1x128xf32> to vector<16x128xf32>
    %21 = arith.addf %18, %20 : vector<16x128xf32>
    %cst_17 = arith.constant 0.000000e+00 : f32
    %22 = vector.broadcast %cst_17 : f32 to vector<16x128xf32>
    %23 = arith.maximumf %21, %22 : vector<16x128xf32>
    %24 = arith.truncf %23 : vector<16x128xf32> to vector<16x128xbf16>
    %c0_18 = arith.constant 0 : index
    %c0_19 = arith.constant 0 : index
    %25 = vector.load %arg8[%c0_18, %c0_19] : memref<128x128xbf16, #tpu.memory_space<vmem>>, vector<128x128xbf16>
    %cst_20 = arith.constant dense<0.000000e+00> : vector<16x128xf32>
    %26 = tpu.matmul %24, %25, %cst_20 {dimension_numbers = #tpu.dot_dimension_numbers<[1], [0], [0], [1], [0, 0, 1, 1], [], []>} : vector<16x128xbf16>, vector<128x128xbf16>, vector<16x128xf32> -> vector<16x128xf32>
    %c0_21 = arith.constant 0 : index
    %c0_22 = arith.constant 0 : index
    %27 = vector.load %arg9[%c0_21, %c0_22] : memref<1x128xf32, #tpu.memory_space<vmem>>, vector<1x128xf32>
    %28 = vector.broadcast %27 : vector<1x128xf32> to vector<16x128xf32>
    %29 = arith.addf %26, %28 : vector<16x128xf32>
    %c0_23 = arith.constant 0 : index
    %c0_24 = arith.constant 0 : index
    %30 = vector.load %arg10[%c0_23, %c0_24] : memref<16x128xf32, #tpu.memory_space<vmem>>, vector<16x128xf32>
    tpu.vector_store %arg10[%c0_23, %c0_24], %29 {strides = array<i32>} : memref<16x128xf32, #tpu.memory_space<vmem>>, vector<16x128xf32>,
    return
  }
  func.func @transform_0(%arg0: i32) -> (i32, i32) {
    %c0_i32 = arith.constant 0 : i32
    %c0_i32_0 = arith.constant 0 : i32
    return %arg0, %c0_i32 : i32, i32
  }
  func.func @transform_1(%arg0: i32) -> (i32, i32) {
    %c0_i32 = arith.constant 0 : i32
    %c0_i32_0 = arith.constant 0 : i32
    %c0_i32_1 = arith.constant 0 : i32
    return %c0_i32, %c0_i32_0 : i32, i32
  }
  func.func @transform_2(%arg0: i32) -> (i32, i32) {
    %c0_i32 = arith.constant 0 : i32
    %c0_i32_0 = arith.constant 0 : i32
    %c0_i32_1 = arith.constant 0 : i32
    return %c0_i32, %c0_i32_0 : i32, i32
  }
  func.func @transform_3(%arg0: i32) -> (i32, i32) {
    %c0_i32 = arith.constant 0 : i32
    %c0_i32_0 = arith.constant 0 : i32
    %c0_i32_1 = arith.constant 0 : i32
    return %c0_i32, %c0_i32_0 : i32, i32
  }
  func.func @transform_4(%arg0: i32) -> (i32, i32) {
    %c0_i32 = arith.constant 0 : i32
    %c0_i32_0 = arith.constant 0 : i32
    %c0_i32_1 = arith.constant 0 : i32
    return %c0_i32, %c0_i32_0 : i32, i32
  }
  func.func @transform_5(%arg0: i32) -> (i32, i32) {
    %c0_i32 = arith.constant 0 : i32
    %c0_i32_0 = arith.constant 0 : i32
    %c0_i32_1 = arith.constant 0 : i32
    return %c0_i32, %c0_i32_0 : i32, i32
  }
  func.func @transform_6(%arg0: i32) -> (i32, i32) {
    %c0_i32 = arith.constant 0 : i32
    %c0_i32_0 = arith.constant 0 : i32
    %c0_i32_1 = arith.constant 0 : i32
    return %c0_i32, %c0_i32_0 : i32, i32
  }
  func.func @transform_7(%arg0: i32) -> (i32, i32) {
    %c0_i32 = arith.constant 0 : i32
    %c0_i32_0 = arith.constant 0 : i32
    %c0_i32_1 = arith.constant 0 : i32
    return %c0_i32, %c0_i32_0 : i32, i32
  }
  func.func @transform_8(%arg0: i32) -> (i32, i32) {
    %c0_i32 = arith.constant 0 : i32
    %c0_i32_0 = arith.constant 0 : i32
    %c0_i32_1 = arith.constant 0 : i32
    return %c0_i32, %c0_i32_0 : i32, i32
  }
  func.func @transform_9(%arg0: i32) -> (i32, i32) {
    %c0_i32 = arith.constant 0 : i32
    %c0_i32_0 = arith.constant 0 : i32
    return %arg0, %c0_i32 : i32, i32
  }
}

</mosaic_0001>

<bundles_post_ra>
// kernel: network_forward.1
= control target key start
LH: loop header
LB: loop body
LE: loop exit
PB: predicated region body
PF: predicated region fallthrough
CT: control target
= control target key end

     0   :  { %14 = vsyncpa [#allocation3], 0  ;;  %s4052_s0 = inlined_call_operand.vmem [shape: bf16[16,1024], index: 0, kind: input, shape index: {}]   ;;  %s4053_s1 = inlined_call_operand.hbm [shape: bf16[1024,512], index: 1, kind: input, shape index: {}]   ;;  %s4054_s2 = inlined_call_operand.vmem [shape: f32[1,512], index: 2, kind: input, shape index: {}]   ;;  %s4055_s3 = inlined_call_operand.hbm [shape: bf16[512,256], index: 3, kind: input, shape index: {}]   ;;  %s4056_s4 = inlined_call_operand.vmem [shape: f32[1,256], index: 4, kind: input, shape index: {}]   ;;  %s4057_s5 = inlined_call_operand.vmem [shape: bf16[256,128], index: 5, kind: input, shape index: {}]   ;;  %s4058_s6 = inlined_call_operand.vmem [shape: f32[1,128], index: 6, kind: input, shape index: {}]   ;;  %s4059_s7 = inlined_call_operand.vmem [shape: bf16[128,128], index: 7, kind: input, shape index: {}]   ;;  %s4060_s8 = inlined_call_operand.vmem [shape: f32[1,128], index: 8, kind: input, shape index: {}]   ;;  %s4061_s9 = inlined_call_operand.vmem [shape: f32[16,128], index: 9, kind: output, shape index: {}]  }
   0x1   :  { %15 = vsyncpa [#allocation5], 0  ;;  %s3815_s30 = smov [#allocation2]   ;;  %s3767_s13 = scalar_lea.hbm %s4053_s1, 32768 }
   0x2   :  { %s23_s10 = sshll.u32 %s3815_s30, 4  ;;  %p3768_p0 = scmp.ne.s32.totalorder %s4053_s1, %s3767_s13  ;;  %s24_s10 = int_to_ptr.vmem [resolvable:$true] %s23_s10 }
   0x3   :  { %p3771_p1 = scmp.lt.u32.totalorder %s3767_s13, %s4053_s1 }
   0x5   :  { %p3773_p2 = pnand %p3771_p1, %p3768_p0 }
   0x7   :  { %3776 = shalt.err (!%p3773_p2)
}
   0x8   :  { %s3777_s18 = scalar_lea.vmem %s24_s10, 32768  ;;  %p3782_p4 = scmp.lt.s32.totalorder %s24_s10, %s24_s10 }
   0x9   :  { %p3778_p3 = scmp.ne.s32.totalorder %s24_s10, %s3777_s18  ;;  %p3783_p5 = scmp.lt.s32.totalorder %s3777_s18, %s3777_s18 }
   0xb   :  { %p3784_p6 = por %p3783_p5, %p3782_p4 }
   0xd   :  { %p3785_p7 = pnand %p3784_p6, %p3778_p3 }
   0xf   :  { %3788 = shalt.err (!%p3785_p7)
}
  0x10   :  { %s3816_s19 = smov 256   ;;  %s3817_s20 = smov 16  }
  0x11   :  { %29 = dma.hbm_to_vmem [thread:$0]  %s4053_s1, 32768, %s24_s10, [#allocation3], %s3816_s19, %s3816_s19, %s3817_s20  }
  0x12   :  { %s3818_s23 = smov [#allocation4]   ;;  %s3789_s27 = scalar_lea.hbm %s4055_s3, 8192 }
  0x13   :  { %s37_s24 = sshll.u32 %s3818_s23, 4  ;;  %p3790_p8 = scmp.ne.s32.totalorder %s4055_s3, %s3789_s27  ;;  %s38_s24 = int_to_ptr.vmem [resolvable:$true] %s37_s24 }
  0x14   :  { %p3793_p9 = scmp.lt.u32.totalorder %s3789_s27, %s4055_s3 }
  0x16   :  { %p3795_p10 = pnand %p3793_p9, %p3790_p8 }
  0x18   :  { %3798 = shalt.err (!%p3795_p10)
}
  0x19   :  { %s3799_s12 = scalar_lea.vmem %s38_s24, 8192  ;;  %p3804_p12 = scmp.lt.s32.totalorder %s38_s24, %s38_s24 }
  0x1a   :  { %p3800_p11 = scmp.ne.s32.totalorder %s38_s24, %s3799_s12  ;;  %p3805_p13 = scmp.lt.s32.totalorder %s3799_s12, %s3799_s12 }
  0x1c   :  { %p3806_p0 = por %p3805_p13, %p3804_p12 }
  0x1e   :  { %p3807_p1 = pnand %p3806_p0, %p3800_p11 }
  0x20   :  { %3810 = shalt.err (!%p3807_p1)
}
  0x21   :  { %s3819_s1 = smov 128   ;;  %s3820_s10 = smov 8  }
  0x22   :  { %43 = dma.hbm_to_vmem [thread:$0]  %s4055_s3, 8192, %s38_s24, [#allocation5], %s3819_s1, %s3819_s1, %s3820_s10  }
  0x23   :  { %3811 = dma.done.wait [#allocation3], 32768  }
  0x24   :  { %3812 = vsyncadd [#allocation3], 4294934528 }
  0x25   :  { %3813 = dma.done.wait [#allocation5], 8192  }
  0x26   :  { %3814 = vsyncadd [#allocation5], 4294959104  ;;  %v3263_v0 = vld [vmem:[#allocation2 + $0x4] ss:$16 sps:$4 sm:$0xff]   ;;  %v3265_v1 = vld [vmem:[#allocation2 + $0xc] ss:$16 sps:$4 sm:$0xff]  }
  0x27   :  { %1667 = vmatprep.subr.bf16.mxu0 %v3263_v0  ;;  %v3267_v2 = vld [vmem:[#allocation2] ss:$16 sps:$4 sm:$0xff]   ;;  %v3268_v3 = vld [vmem:[#allocation2 + $0x8] ss:$16 sps:$4 sm:$0xff]   ;;  %1839 = vmatprep.subr.bf16.mxu1 %v3265_v1  ;;  %v3269_v4 = vld [vmem:[#allocation2 + $0x24] ss:$16 sps:$4 sm:$0xff]  }
  0x28   :  { %1668 = vmatpush1.bf16.msra.mxu0 %v3267_v2  ;;  %1840 = vmatpush1.bf16.msra.mxu1 %v3268_v3  ;;  %v3271_v5 = vld [vmem:[#allocation2 + $0x2c] ss:$16 sps:$4 sm:$0xff]   ;;  %v3273_v6 = vld [vmem:[#allocation2 + $0x20] ss:$16 sps:$4 sm:$0xff]   ;;  %v3274_v7 = vld [vmem:[#allocation2 + $0x28] ss:$16 sps:$4 sm:$0xff]  }
  0x29   :  { %1669 = vmatprep.subr.bf16.mxu0 %v3269_v4  ;;  %1841 = vmatprep.subr.bf16.mxu1 %v3271_v5  ;;  %v3275_v8 = vld [vmem:[#allocation2 + $0x44] ss:$16 sps:$4 sm:$0xff]   ;;  %v3277_v9 = vld [vmem:[#allocation2 + $0x4c] ss:$16 sps:$4 sm:$0xff]   ;;  %v3279_v10 = vld [vmem:[#allocation2 + $0x40] ss:$16 sps:$4 sm:$0xff]  }
  0x2a   :  { %v3280_v11 = vld [vmem:[#allocation2 + $0x48] ss:$16 sps:$4 sm:$0xff]   ;;  %v3281_v12 = vld [vmem:[#allocation2 + $0x64] ss:$16 sps:$4 sm:$0xff]   ;;  %v3283_v13 = vld [vmem:[#allocation2 + $0x6c] ss:$16 sps:$4 sm:$0xff]  }
  0x2b   :  { %v3285_v14 = vld [vmem:[#allocation2 + $0x60] ss:$16 sps:$4 sm:$0xff]   ;;  %v3286_v15 = vld [vmem:[#allocation2 + $0x68] ss:$16 sps:$4 sm:$0xff]   ;;  %v3287_v16 = vld [vmem:[#allocation2 + $0x84] ss:$16 sps:$4 sm:$0xff]  }
  0x2c   :  { %1670 = vmatpush1.bf16.msra.mxu0 %v3273_v6  ;;  %1842 = vmatpush1.bf16.msra.mxu1 %v3274_v7  ;;  %v3289_v17 = vld [vmem:[#allocation2 + $0x8c] ss:$16 sps:$4 sm:$0xff]   ;;  %v3291_v18 = vld [vmem:[#allocation2 + $0x80] ss:$16 sps:$4 sm:$0xff]   ;;  %v3292_v19 = vld [vmem:[#allocation2 + $0x88] ss:$16 sps:$4 sm:$0xff]  }
  0x2d   :  { %1671 = vmatprep.subr.bf16.mxu0 %v3275_v8  ;;  %1843 = vmatprep.subr.bf16.mxu1 %v3277_v9  ;;  %v3293_v20 = vld [vmem:[#allocation2 + $0xa4] ss:$16 sps:$4 sm:$0xff]   ;;  %v3295_v21 = vld [vmem:[#allocation2 + $0xac] ss:$16 sps:$4 sm:$0xff]   ;;  %v3297_v22 = vld [vmem:[#allocation2 + $0xa0] ss:$16 sps:$4 sm:$0xff]  }
  0x2e   :  { %v3298_v23 = vld [vmem:[#allocation2 + $0xa8] ss:$16 sps:$4 sm:$0xff]   ;;  %v3299_v24 = vld [vmem:[#allocation2 + $0xc4] ss:$16 sps:$4 sm:$0xff]   ;;  %v3301_v25 = vld [vmem:[#allocation2 + $0xcc] ss:$16 sps:$4 sm:$0xff]  }
  0x2f   :  { %v3303_v26 = vld [vmem:[#allocation2 + $0xc0] ss:$16 sps:$4 sm:$0xff]   ;;  %v3304_v27 = vld [vmem:[#allocation2 + $0xc8] ss:$16 sps:$4 sm:$0xff]   ;;  %v3305_v28 = vld [vmem:[#allocation2 + $0xe4] ss:$16 sps:$4 sm:$0xff]  }
  0x30   :  { %1672 = vmatpush1.bf16.msra.mxu0 %v3279_v10  ;;  %1844 = vmatpush1.bf16.msra.mxu1 %v3280_v11  ;;  %v3307_v29 = vld [vmem:[#allocation2 + $0xec] ss:$16 sps:$4 sm:$0xff]   ;;  %v3309_v30 = vld [vmem:[#allocation2 + $0xe0] ss:$16 sps:$4 sm:$0xff]   ;;  %v3310_v31 = vld [vmem:[#allocation2 + $0xe8] ss:$16 sps:$4 sm:$0xff]  }
  0x31   :  { %1673 = vmatprep.subr.bf16.mxu0 %v3281_v12  ;;  %1845 = vmatprep.subr.bf16.mxu1 %v3283_v13  ;;  %v3311_v32 = vld [vmem:[#allocation2 + $0x104] ss:$16 sps:$4 sm:$0xff]   ;;  %v3313_v33 = vld [vmem:[#allocation2 + $0x10c] ss:$16 sps:$4 sm:$0xff]   ;;  %v3315_v34 = vld [vmem:[#allocation2 + $0x100] ss:$16 sps:$4 sm:$0xff]  }
  0x32   :  { %v3316_v35 = vld [vmem:[#allocation2 + $0x108] ss:$16 sps:$4 sm:$0xff]   ;;  %v3317_v36 = vld [vmem:[#allocation2 + $0x124] ss:$16 sps:$4 sm:$0xff]   ;;  %v3319_v37 = vld [vmem:[#allocation2 + $0x12c] ss:$16 sps:$4 sm:$0xff]  }
  0x33   :  { %v3321_v38 = vld [vmem:[#allocation2 + $0x120] ss:$16 sps:$4 sm:$0xff]   ;;  %v3322_v39 = vld [vmem:[#allocation2 + $0x128] ss:$16 sps:$4 sm:$0xff]   ;;  %v3323_v40 = vld [vmem:[#allocation2 + $0x144] ss:$16 sps:$4 sm:$0xff]  }
  0x34   :  { %1674 = vmatpush1.bf16.msra.mxu0 %v3285_v14  ;;  %1846 = vmatpush1.bf16.msra.mxu1 %v3286_v15  ;;  %v3325_v41 = vld [vmem:[#allocation2 + $0x14c] ss:$16 sps:$4 sm:$0xff]   ;;  %v3327_v42 = vld [vmem:[#allocation2 + $0x140] ss:$16 sps:$4 sm:$0xff]   ;;  %v3328_v43 = vld [vmem:[#allocation2 + $0x148] ss:$16 sps:$4 sm:$0xff]  }
  0x35   :  { %1675 = vmatprep.subr.bf16.mxu0 %v3287_v16  ;;  %1847 = vmatprep.subr.bf16.mxu1 %v3289_v17  ;;  %v3329_v44 = vld [vmem:[#allocation2 + $0x164] ss:$16 sps:$4 sm:$0xff]   ;;  %v3331_v45 = vld [vmem:[#allocation2 + $0x16c] ss:$16 sps:$4 sm:$0xff]   ;;  %v3333_v48 = vld [vmem:[#allocation2 + $0x160] ss:$16 sps:$4 sm:$0xff]  }
  0x36   :  { %v61_v46 = vld [vmem:[%s4052_s0] sm:$0xff]  ;;  %v3334_v49 = vld [vmem:[#allocation2 + $0x168] ss:$16 sps:$4 sm:$0xff]   ;;  %v3337_v52 = vld [vmem:[#allocation2 + $0x18c] ss:$16 sps:$4 sm:$0xff]   ;;  %vm3822_vm0 = vmmov 0  }
  0x37   :  { %v65_v47 = vld [vmem:[%s4052_s0 + $0x20] sm:$0xff]  ;;  %v3340_v54 = vld [vmem:[#allocation2 + $0x188] ss:$16 sps:$4 sm:$0xff]   ;;  %v3343_v56 = vld [vmem:[#allocation2 + $0x1ac] ss:$16 sps:$4 sm:$0xff]  }
  0x38   :  { %1676 = vmatpush1.bf16.msra.mxu0 %v3291_v18  ;;  %1848 = vmatpush1.bf16.msra.mxu1 %v3292_v19  ;;  %v2811_v50 = vcombine.high %v61_v46, %v65_v47  ;;  %v3335_v51 = vld [vmem:[#allocation2 + $0x184] ss:$16 sps:$4 sm:$0xff]   ;;  %v3339_v53 = vld [vmem:[#allocation2 + $0x180] ss:$16 sps:$4 sm:$0xff]   ;;  %v3346_v58 = vld [vmem:[#allocation2 + $0x1a8] ss:$16 sps:$4 sm:$0xff]   ;;  %v2810_v5 = vcombine.low %v61_v46, %v65_v47 }
  0x39   :  { %1677 = vmatprep.subr.bf16.mxu0 %v3293_v20  ;;  %1849 = vmatprep.subr.bf16.mxu1 %v3295_v21  ;;  %v3341_v55 = vld [vmem:[#allocation2 + $0x1a4] ss:$16 sps:$4 sm:$0xff]   ;;  %v3345_v57 = vld [vmem:[#allocation2 + $0x1a0] ss:$16 sps:$4 sm:$0xff]   ;;  %v3349_v60 = vld [vmem:[#allocation2 + $0x1cc] ss:$16 sps:$4 sm:$0xff]  }
  0x3a   :  { %1699 = vmatprep.mubr.bf16.mxu0 %v2811_v50  ;;  %1871 = vmatprep.mubr.bf16.mxu1 %v2811_v50  ;;  %v3347_v59 = vld [vmem:[#allocation2 + $0x1c4] ss:$16 sps:$4 sm:$0xff]   ;;  %v3351_v61 = vld [vmem:[#allocation2 + $0x1c0] ss:$16 sps:$4 sm:$0xff]   ;;  %v3352_v62 = vld [vmem:[#allocation2 + $0x1c8] ss:$16 sps:$4 sm:$0xff]  }
  0x3b   :  { %v3353_v63 = vld [vmem:[#allocation2 + $0x1e4] ss:$16 sps:$4 sm:$0xff]   ;;  %v3355_v0 = vld [vmem:[#allocation2 + $0x1ec] ss:$16 sps:$4 sm:$0xff]   ;;  %v3357_v1 = vld [vmem:[#allocation2 + $0x1e0] ss:$16 sps:$4 sm:$0xff]  }
  0x3c   :  { %1678 = vmatpush1.bf16.msra.mxu0 %v3297_v22  ;;  %1850 = vmatpush1.bf16.msra.mxu1 %v3298_v23  ;;  %v3358_v2 = vld [vmem:[#allocation2 + $0x1e8] ss:$16 sps:$4 sm:$0xff]   ;;  %v3361_v3 = vld [vmem:[#allocation2 + $0x204] ss:$16 sps:$4 sm:$0xff]   ;;  %v3364_v4 = vld [vmem:[#allocation2 + $0x20c] ss:$16 sps:$4 sm:$0xff]  }
  0x3d   :  { %1679 = vmatprep.subr.bf16.mxu0 %v3299_v24  ;;  %1851 = vmatprep.subr.bf16.mxu1 %v3301_v25  ;;  %v3359_v6 = vld [vmem:[#allocation2 + $0x200] ss:$16 sps:$4 sm:$0xff]   ;;  %v3362_v7 = vld [vmem:[#allocation2 + $0x208] ss:$16 sps:$4 sm:$0xff]   ;;  %v3367_v8 = vld [vmem:[#allocation2 + $0x224] ss:$16 sps:$4 sm:$0xff]  }
  0x3e   :  { %v3370_v9 = vld [vmem:[#allocation2 + $0x22c] ss:$16 sps:$4 sm:$0xff]   ;;  %v3365_v10 = vld [vmem:[#allocation2 + $0x220] ss:$16 sps:$4 sm:$0xff]   ;;  %v3368_v11 = vld [vmem:[#allocation2 + $0x228] ss:$16 sps:$4 sm:$0xff]  }
  0x3f   :  { %v3373_v12 = vld [vmem:[#allocation2 + $0x244] ss:$16 sps:$4 sm:$0xff]   ;;  %v3376_v13 = vld [vmem:[#allocation2 + $0x24c] ss:$16 sps:$4 sm:$0xff]   ;;  %v3371_v14 = vld [vmem:[#allocation2 + $0x240] ss:$16 sps:$4 sm:$0xff]  }
  0x40   :  { %1680 = vmatpush1.bf16.msra.mxu0 %v3303_v26  ;;  %1852 = vmatpush1.bf16.msra.mxu1 %v3304_v27  ;;  %v3374_v15 = vld [vmem:[#allocation2 + $0x248] ss:$16 sps:$4 sm:$0xff]   ;;  %v3379_v16 = vld [vmem:[#allocation2 + $0x264] ss:$16 sps:$4 sm:$0xff]   ;;  %v3382_v17 = vld [vmem:[#allocation2 + $0x26c] ss:$16 sps:$4 sm:$0xff]  }
  0x41   :  { %1681 = vmatprep.subr.bf16.mxu0 %v3305_v28  ;;  %1853 = vmatprep.subr.bf16.mxu1 %v3307_v29  ;;  %v3377_v18 = vld [vmem:[#allocation2 + $0x260] ss:$16 sps:$4 sm:$0xff]   ;;  %v3380_v19 = vld [vmem:[#allocation2 + $0x268] ss:$16 sps:$4 sm:$0xff]   ;;  %v3385_v20 = vld [vmem:[#allocation2 + $0x284] ss:$16 sps:$4 sm:$0xff]  }
  0x42   :  { %v3388_v21 = vld [vmem:[#allocation2 + $0x28c] ss:$16 sps:$4 sm:$0xff]   ;;  %v3383_v22 = vld [vmem:[#allocation2 + $0x280] ss:$16 sps:$4 sm:$0xff]   ;;  %v3386_v23 = vld [vmem:[#allocation2 + $0x288] ss:$16 sps:$4 sm:$0xff]  }
  0x43   :  { %v3391_v24 = vld [vmem:[#allocation2 + $0x2a4] ss:$16 sps:$4 sm:$0xff]   ;;  %v3394_v25 = vld [vmem:[#allocation2 + $0x2ac] ss:$16 sps:$4 sm:$0xff]   ;;  %v3389_v26 = vld [vmem:[#allocation2 + $0x2a0] ss:$16 sps:$4 sm:$0xff]  }
  0x44   :  { %1682 = vmatpush1.bf16.msra.mxu0 %v3309_v30  ;;  %1854 = vmatpush1.bf16.msra.mxu1 %v3310_v31  ;;  %v3392_v27 = vld [vmem:[#allocation2 + $0x2a8] ss:$16 sps:$4 sm:$0xff]   ;;  %v3397_v28 = vld [vmem:[#allocation2 + $0x2c4] ss:$16 sps:$4 sm:$0xff]   ;;  %v3400_v29 = vld [vmem:[#allocation2 + $0x2cc] ss:$16 sps:$4 sm:$0xff]  }
  0x45   :  { %1683 = vmatprep.subr.bf16.mxu0 %v3311_v32  ;;  %1855 = vmatprep.subr.bf16.mxu1 %v3313_v33  ;;  %v3906_v30 = vld [vmem:[%s4052_s0 + $0x8] sm:$0xff]  ;;  %v3395_v32 = vld [vmem:[#allocation2 + $0x2c0] ss:$16 sps:$4 sm:$0xff]   ;;  %v3421_v47 = vld [vmem:[#allocation2 + $0x344] ss:$16 sps:$4 sm:$0xff]  }
  0x46   :  { %v3911_v31 = vld [vmem:[%s4052_s0 + $0x28] sm:$0xff] }
  0x47   :  { %v3398_v33 = vld [vmem:[#allocation2 + $0x2c8] ss:$16 sps:$4 sm:$0xff]  }
  0x48   :  { %1684 = vmatpush1.bf16.msra.mxu0 %v3315_v34  ;;  %1856 = vmatpush1.bf16.msra.mxu1 %v3316_v35  ;;  %v2813_v34 = vcombine.high %v3906_v30, %v3911_v31  ;;  %v3403_v35 = vld [vmem:[#allocation2 + $0x2e4] ss:$16 sps:$4 sm:$0xff]   ;;  %v3416_v46 = vld [vmem:[#allocation2 + $0x328] ss:$16 sps:$4 sm:$0xff]  }
  0x49   :  { %1685 = vmatprep.subr.bf16.mxu0 %v3317_v36  ;;  %1857 = vmatprep.subr.bf16.mxu1 %v3319_v37  ;;  %v3406_v36 = vld [vmem:[#allocation2 + $0x2ec] ss:$16 sps:$4 sm:$0xff]   ;;  %v3401_v37 = vld [vmem:[#allocation2 + $0x2e0] ss:$16 sps:$4 sm:$0xff]   ;;  %v3422_v50 = vld [vmem:[#allocation2 + $0x348] ss:$16 sps:$4 sm:$0xff]  }
  0x4c   :  { %1686 = vmatpush1.bf16.msra.mxu0 %v3321_v38  ;;  %1858 = vmatpush1.bf16.msra.mxu1 %v3322_v39  ;;  %v3404_v38 = vld [vmem:[#allocation2 + $0x2e8] ss:$16 sps:$4 sm:$0xff]   ;;  %v3409_v39 = vld [vmem:[#allocation2 + $0x304] ss:$16 sps:$4 sm:$0xff]  }
  0x4d   :  { %1687 = vmatprep.subr.bf16.mxu0 %v3323_v40  ;;  %1859 = vmatprep.subr.bf16.mxu1 %v3325_v41  ;;  %v3412_v40 = vld [vmem:[#allocation2 + $0x30c] ss:$16 sps:$4 sm:$0xff]   ;;  %v3407_v41 = vld [vmem:[#allocation2 + $0x300] ss:$16 sps:$4 sm:$0xff]  }
  0x50   :  { %1688 = vmatpush1.bf16.msra.mxu0 %v3327_v42  ;;  %1860 = vmatpush1.bf16.msra.mxu1 %v3328_v43  ;;  %v3410_v42 = vld [vmem:[#allocation2 + $0x308] ss:$16 sps:$4 sm:$0xff]   ;;  %v3415_v43 = vld [vmem:[#allocation2 + $0x324] ss:$16 sps:$4 sm:$0xff]  }
  0x51   :  { %1689 = vmatprep.subr.bf16.mxu0 %v3329_v44  ;;  %1861 = vmatprep.subr.bf16.mxu1 %v3331_v45  ;;  %v3418_v44 = vld [vmem:[#allocation2 + $0x32c] ss:$16 sps:$4 sm:$0xff]   ;;  %v3413_v45 = vld [vmem:[#allocation2 + $0x320] ss:$16 sps:$4 sm:$0xff]  }
  0x54   :  { %1690 = vmatpush1.bf16.msra.mxu0 %v3333_v48  ;;  %1862 = vmatpush1.bf16.msra.mxu1 %v3334_v49  ;;  %v3424_v48 = vld [vmem:[#allocation2 + $0x34c] ss:$16 sps:$4 sm:$0xff]   ;;  %v3419_v49 = vld [vmem:[#allocation2 + $0x340] ss:$16 sps:$4 sm:$0xff]  }
  0x55   :  { %1691 = vmatprep.subr.bf16.mxu0 %v3335_v51  ;;  %1863 = vmatprep.subr.bf16.mxu1 %v3337_v52  ;;  %v3427_v51 = vld [vmem:[#allocation2 + $0x364] ss:$16 sps:$4 sm:$0xff]   ;;  %v3430_v52 = vld [vmem:[#allocation2 + $0x36c] ss:$16 sps:$4 sm:$0xff]  }
  0x58   :  { %1692 = vmatpush1.bf16.msra.mxu0 %v3339_v53  ;;  %1864 = vmatpush1.bf16.msra.mxu1 %v3340_v54  ;;  %v3425_v53 = vld [vmem:[#allocation2 + $0x360] ss:$16 sps:$4 sm:$0xff]   ;;  %v3428_v54 = vld [vmem:[#allocation2 + $0x368] ss:$16 sps:$4 sm:$0xff]  }
  0x59   :  { %1693 = vmatprep.subr.bf16.mxu0 %v3341_v55  ;;  %1865 = vmatprep.subr.bf16.mxu1 %v3343_v56  ;;  %v3433_v55 = vld [vmem:[#allocation2 + $0x384] ss:$16 sps:$4 sm:$0xff]   ;;  %v3436_v56 = vld [vmem:[#allocation2 + $0x38c] ss:$16 sps:$4 sm:$0xff]  }
  0x5c   :  { %1694 = vmatpush1.bf16.msra.mxu0 %v3345_v57  ;;  %1866 = vmatpush1.bf16.msra.mxu1 %v3346_v58  ;;  %v3431_v57 = vld [vmem:[#allocation2 + $0x380] ss:$16 sps:$4 sm:$0xff]   ;;  %v3434_v58 = vld [vmem:[#allocation2 + $0x388] ss:$16 sps:$4 sm:$0xff]  }
  0x5d   :  { %1695 = vmatprep.subr.bf16.mxu0 %v3347_v59  ;;  %1867 = vmatprep.subr.bf16.mxu1 %v3349_v60  ;;  %v3439_v59 = vld [vmem:[#allocation2 + $0x3a4] ss:$16 sps:$4 sm:$0xff]   ;;  %v3442_v60 = vld [vmem:[#allocation2 + $0x3ac] ss:$16 sps:$4 sm:$0xff]  }
  0x60   :  { %1696 = vmatpush1.bf16.msra.mxu0 %v3351_v61  ;;  %1868 = vmatpush1.bf16.msra.mxu1 %v3352_v62  ;;  %v3437_v61 = vld [vmem:[#allocation2 + $0x3a0] ss:$16 sps:$4 sm:$0xff]   ;;  %v3440_v62 = vld [vmem:[#allocation2 + $0x3a8] ss:$16 sps:$4 sm:$0xff]  }
  0x61   :  { %1697 = vmatprep.subr.bf16.mxu0 %v3353_v63  ;;  %1869 = vmatprep.subr.bf16.mxu1 %v3355_v0  ;;  %v3445_v63 = vld [vmem:[#allocation2 + $0x3c4] ss:$16 sps:$4 sm:$0xff]   ;;  %v3448_v0 = vld [vmem:[#allocation2 + $0x3cc] ss:$16 sps:$4 sm:$0xff]  }
  0x64   :  { %1698 = vmatpush1.bf16.msra.mxu0 %v3357_v1  ;;  %1870 = vmatpush1.bf16.msra.mxu1 %v3358_v2  ;;  %v3443_v1 = vld [vmem:[#allocation2 + $0x3c0] ss:$16 sps:$4 sm:$0xff]   ;;  %v3446_v2 = vld [vmem:[#allocation2 + $0x3c8] ss:$16 sps:$4 sm:$0xff]  }
  0x65   :  { %1710 = vmatprep.subr.bf16.mxu0 %v3361_v3  ;;  %1882 = vmatprep.subr.bf16.mxu1 %v3364_v4  ;;  %v3451_v3 = vld [vmem:[#allocation2 + $0x3e4] ss:$16 sps:$4 sm:$0xff]   ;;  %v3454_v4 = vld [vmem:[#allocation2 + $0x3ec] ss:$16 sps:$4 sm:$0xff]  }
  0x67   :  { %1700 = vmatmul.mubr.bf16.vlgmr.msra.gmra.mrb[0].mxu0 %v2810_v5  ;;  %1872 = vmatmul.mubr.bf16.vlgmr.msra.gmra.mrb[0].mxu1 %v2810_v5  ;;  %v3449_v5 = vld [vmem:[#allocation2 + $0x3e0] ss:$16 sps:$4 sm:$0xff]  }
  0x68   :  { %1711 = vmatpush1.bf16.msra.mxu0 %v3359_v6  ;;  %1883 = vmatpush1.bf16.msra.mxu1 %v3362_v7  ;;  %v3452_v6 = vld [vmem:[#allocation2 + $0x3e8] ss:$16 sps:$4 sm:$0xff]   ;;  %v3457_v7 = vld [vmem:[#allocation2 + $0x404] ss:$16 sps:$4 sm:$0xff]  }
  0x69   :  { %1712 = vmatprep.subr.bf16.mxu0 %v3367_v8  ;;  %1884 = vmatprep.subr.bf16.mxu1 %v3370_v9  ;;  %v3460_v8 = vld [vmem:[#allocation2 + $0x40c] ss:$16 sps:$4 sm:$0xff]   ;;  %v2812_v9 = vcombine.low %v3906_v30, %v3911_v31  ;;  %v3482_v30 = vld [vmem:[#allocation2 + $0x488] ss:$16 sps:$4 sm:$0xff]   ;;  %v3487_v31 = vld [vmem:[#allocation2 + $0x4a4] ss:$16 sps:$4 sm:$0xff]  }
  0x6a   :  { %1742 = vmatprep.mubr.bf16.mxu0 %v2813_v34  ;;  %1914 = vmatprep.mubr.bf16.mxu1 %v2813_v34  ;;  %v3488_v34 = vld [vmem:[#allocation2 + $0x4a8] ss:$16 sps:$4 sm:$0xff]  }
  0x6c   :  { %1713 = vmatpush1.bf16.msra.mxu0 %v3365_v10  ;;  %1885 = vmatpush1.bf16.msra.mxu1 %v3368_v11  ;;  %v3455_v10 = vld [vmem:[#allocation2 + $0x400] ss:$16 sps:$4 sm:$0xff]   ;;  %v3458_v11 = vld [vmem:[#allocation2 + $0x408] ss:$16 sps:$4 sm:$0xff]  }
  0x6d   :  { %1714 = vmatprep.subr.bf16.mxu0 %v3373_v12  ;;  %1886 = vmatprep.subr.bf16.mxu1 %v3376_v13  ;;  %v3463_v12 = vld [vmem:[#allocation2 + $0x424] ss:$16 sps:$4 sm:$0xff]   ;;  %v3466_v13 = vld [vmem:[#allocation2 + $0x42c] ss:$16 sps:$4 sm:$0xff]  }
  0x70   :  { %1715 = vmatpush1.bf16.msra.mxu0 %v3371_v14  ;;  %1887 = vmatpush1.bf16.msra.mxu1 %v3374_v15  ;;  %v3920_v14 = vld [vmem:[%s4052_s0 + $0x10] sm:$0xff] }
  0x71   :  { %1716 = vmatprep.subr.bf16.mxu0 %v3379_v16  ;;  %1888 = vmatprep.subr.bf16.mxu1 %v3382_v17  ;;  %v3925_v15 = vld [vmem:[%s4052_s0 + $0x30] sm:$0xff] }
  0x72   :  { %v2815_v16 = vcombine.high %v3920_v14, %v3925_v15  ;;  %v3461_v17 = vld [vmem:[#allocation2 + $0x420] ss:$16 sps:$4 sm:$0xff]  }
  0x74   :  { %1717 = vmatpush1.bf16.msra.mxu0 %v3377_v18  ;;  %1889 = vmatpush1.bf16.msra.mxu1 %v3380_v19  ;;  %v3464_v18 = vld [vmem:[#allocation2 + $0x428] ss:$16 sps:$4 sm:$0xff]   ;;  %v3469_v19 = vld [vmem:[#allocation2 + $0x444] ss:$16 sps:$4 sm:$0xff]  }
  0x75   :  { %1718 = vmatprep.subr.bf16.mxu0 %v3385_v20  ;;  %1890 = vmatprep.subr.bf16.mxu1 %v3388_v21  ;;  %v3472_v20 = vld [vmem:[#allocation2 + $0x44c] ss:$16 sps:$4 sm:$0xff]   ;;  %v3467_v21 = vld [vmem:[#allocation2 + $0x440] ss:$16 sps:$4 sm:$0xff]  }
  0x78   :  { %1719 = vmatpush1.bf16.msra.mxu0 %v3383_v22  ;;  %1891 = vmatpush1.bf16.msra.mxu1 %v3386_v23  ;;  %v3470_v22 = vld [vmem:[#allocation2 + $0x448] ss:$16 sps:$4 sm:$0xff]   ;;  %v3475_v23 = vld [vmem:[#allocation2 + $0x464] ss:$16 sps:$4 sm:$0xff]  }
  0x79   :  { %1720 = vmatprep.subr.bf16.mxu0 %v3391_v24  ;;  %1892 = vmatprep.subr.bf16.mxu1 %v3394_v25  ;;  %v3478_v24 = vld [vmem:[#allocation2 + $0x46c] ss:$16 sps:$4 sm:$0xff]   ;;  %v3473_v25 = vld [vmem:[#allocation2 + $0x460] ss:$16 sps:$4 sm:$0xff]  }
  0x7c   :  { %1721 = vmatpush1.bf16.msra.mxu0 %v3389_v26  ;;  %1893 = vmatpush1.bf16.msra.mxu1 %v3392_v27  ;;  %v3476_v26 = vld [vmem:[#allocation2 + $0x468] ss:$16 sps:$4 sm:$0xff]   ;;  %v3481_v27 = vld [vmem:[#allocation2 + $0x484] ss:$16 sps:$4 sm:$0xff]  }
  0x7d   :  { %1722 = vmatprep.subr.bf16.mxu0 %v3397_v28  ;;  %1894 = vmatprep.subr.bf16.mxu1 %v3400_v29  ;;  %v3484_v28 = vld [vmem:[#allocation2 + $0x48c] ss:$16 sps:$4 sm:$0xff]   ;;  %v3479_v29 = vld [vmem:[#allocation2 + $0x480] ss:$16 sps:$4 sm:$0xff]  }
  0x80   :  { %1723 = vmatpush1.bf16.msra.mxu0 %v3395_v32  ;;  %1895 = vmatpush1.bf16.msra.mxu1 %v3398_v33  ;;  %v3490_v32 = vld [vmem:[#allocation2 + $0x4ac] ss:$16 sps:$4 sm:$0xff]   ;;  %v3485_v33 = vld [vmem:[#allocation2 + $0x4a0] ss:$16 sps:$4 sm:$0xff]  }
  0x81   :  { %1724 = vmatprep.subr.bf16.mxu0 %v3403_v35  ;;  %1896 = vmatprep.subr.bf16.mxu1 %v3406_v36  ;;  %v3493_v35 = vld [vmem:[#allocation2 + $0x4c4] ss:$16 sps:$4 sm:$0xff]   ;;  %v3496_v36 = vld [vmem:[#allocation2 + $0x4cc] ss:$16 sps:$4 sm:$0xff]  }
  0x84   :  { %1725 = vmatpush1.bf16.msra.mxu0 %v3401_v37  ;;  %1897 = vmatpush1.bf16.msra.mxu1 %v3404_v38  ;;  %v3491_v37 = vld [vmem:[#allocation2 + $0x4c0] ss:$16 sps:$4 sm:$0xff]   ;;  %v3494_v38 = vld [vmem:[#allocation2 + $0x4c8] ss:$16 sps:$4 sm:$0xff]  }
  0x85   :  { %1726 = vmatprep.subr.bf16.mxu0 %v3409_v39  ;;  %1898 = vmatprep.subr.bf16.mxu1 %v3412_v40  ;;  %v3499_v39 = vld [vmem:[#allocation2 + $0x4e4] ss:$16 sps:$4 sm:$0xff]   ;;  %v3502_v40 = vld [vmem:[#allocation2 + $0x4ec] ss:$16 sps:$4 sm:$0xff]  }
  0x88   :  { %1727 = vmatpush1.bf16.msra.mxu0 %v3407_v41  ;;  %1899 = vmatpush1.bf16.msra.mxu1 %v3410_v42  ;;  %v3497_v41 = vld [vmem:[#allocation2 + $0x4e0] ss:$16 sps:$4 sm:$0xff]   ;;  %v3500_v42 = vld [vmem:[#allocation2 + $0x4e8] ss:$16 sps:$4 sm:$0xff]  }
  0x89   :  { %1728 = vmatprep.subr.bf16.mxu0 %v3415_v43  ;;  %1900 = vmatprep.subr.bf16.mxu1 %v3418_v44  ;;  %v3505_v43 = vld [vmem:[#allocation2 + $0x504] ss:$16 sps:$4 sm:$0xff]   ;;  %v3508_v44 = vld [vmem:[#allocation2 + $0x50c] ss:$16 sps:$4 sm:$0xff]  }
  0x8c   :  { %1729 = vmatpush1.bf16.msra.mxu0 %v3413_v45  ;;  %1901 = vmatpush1.bf16.msra.mxu1 %v3416_v46  ;;  %v3503_v45 = vld [vmem:[#allocation2 + $0x500] ss:$16 sps:$4 sm:$0xff]   ;;  %v3506_v46 = vld [vmem:[#allocation2 + $0x508] ss:$16 sps:$4 sm:$0xff]  }
  0x8d   :  { %1730 = vmatprep.subr.bf16.mxu0 %v3421_v47  ;;  %1902 = vmatprep.subr.bf16.mxu1 %v3424_v48  ;;  %v3511_v47 = vld [vmem:[#allocation2 + $0x524] ss:$16 sps:$4 sm:$0xff]   ;;  %v3514_v48 = vld [vmem:[#allocation2 + $0x52c] ss:$16 sps:$4 sm:$0xff]  }
  0x90   :  { %1731 = vmatpush1.bf16.msra.mxu0 %v3419_v49  ;;  %1903 = vmatpush1.bf16.msra.mxu1 %v3422_v50  ;;  %v3509_v49 = vld [vmem:[#allocation2 + $0x520] ss:$16 sps:$4 sm:$0xff]   ;;  %v3512_v50 = vld [vmem:[#allocation2 + $0x528] ss:$16 sps:$4 sm:$0xff]  }
  0x91   :  { %1732 = vmatprep.subr.bf16.mxu0 %v3427_v51  ;;  %1904 = vmatprep.subr.bf16.mxu1 %v3430_v52  ;;  %v3517_v51 = vld [vmem:[#allocation2 + $0x544] ss:$16 sps:$4 sm:$0xff]   ;;  %v3520_v52 = vld [vmem:[#allocation2 + $0x54c] ss:$16 sps:$4 sm:$0xff]  }
  0x94   :  { %1733 = vmatpush1.bf16.msra.mxu0 %v3425_v53  ;;  %1905 = vmatpush1.bf16.msra.mxu1 %v3428_v54  ;;  %v3515_v53 = vld [vmem:[#allocation2 + $0x540] ss:$16 sps:$4 sm:$0xff]   ;;  %v3518_v54 = vld [vmem:[#allocation2 + $0x548] ss:$16 sps:$4 sm:$0xff]  }
  0x95   :  { %1734 = vmatprep.subr.bf16.mxu0 %v3433_v55  ;;  %1906 = vmatprep.subr.bf16.mxu1 %v3436_v56  ;;  %v3523_v55 = vld [vmem:[#allocation2 + $0x564] ss:$16 sps:$4 sm:$0xff]   ;;  %v3526_v56 = vld [vmem:[#allocation2 + $0x56c] ss:$16 sps:$4 sm:$0xff]  }
  0x98   :  { %1735 = vmatpush1.bf16.msra.mxu0 %v3431_v57  ;;  %1907 = vmatpush1.bf16.msra.mxu1 %v3434_v58  ;;  %v3521_v57 = vld [vmem:[#allocation2 + $0x560] ss:$16 sps:$4 sm:$0xff]   ;;  %v3524_v58 = vld [vmem:[#allocation2 + $0x568] ss:$16 sps:$4 sm:$0xff]  }
  0x99   :  { %1736 = vmatprep.subr.bf16.mxu0 %v3439_v59  ;;  %1908 = vmatprep.subr.bf16.mxu1 %v3442_v60  ;;  %v3529_v59 = vld [vmem:[#allocation2 + $0x584] ss:$16 sps:$4 sm:$0xff]   ;;  %v3532_v60 = vld [vmem:[#allocation2 + $0x58c] ss:$16 sps:$4 sm:$0xff]  }
  0x9c   :  { %1737 = vmatpush1.bf16.msra.mxu0 %v3437_v61  ;;  %1909 = vmatpush1.bf16.msra.mxu1 %v3440_v62  ;;  %v3527_v61 = vld [vmem:[#allocation2 + $0x580] ss:$16 sps:$4 sm:$0xff]   ;;  %v3530_v62 = vld [vmem:[#allocation2 + $0x588] ss:$16 sps:$4 sm:$0xff]  }
  0x9d   :  { %1738 = vmatprep.subr.bf16.mxu0 %v3445_v63  ;;  %1910 = vmatprep.subr.bf16.mxu1 %v3448_v0  ;;  %v3535_v63 = vld [vmem:[#allocation2 + $0x5a4] ss:$16 sps:$4 sm:$0xff]   ;;  %v3538_v0 = vld [vmem:[#allocation2 + $0x5ac] ss:$16 sps:$4 sm:$0xff]  }
  0xa0   :  { %1739 = vmatpush1.bf16.msra.mxu0 %v3443_v1  ;;  %1911 = vmatpush1.bf16.msra.mxu1 %v3446_v2  ;;  %v3533_v1 = vld [vmem:[#allocation2 + $0x5a0] ss:$16 sps:$4 sm:$0xff]   ;;  %v3536_v2 = vld [vmem:[#allocation2 + $0x5a8] ss:$16 sps:$4 sm:$0xff]  }
  0xa1   :  { %1740 = vmatprep.subr.bf16.mxu0 %v3451_v3  ;;  %1912 = vmatprep.subr.bf16.mxu1 %v3454_v4  ;;  %v3541_v3 = vld [vmem:[#allocation2 + $0x5c4] ss:$16 sps:$4 sm:$0xff]   ;;  %v3544_v4 = vld [vmem:[#allocation2 + $0x5cc] ss:$16 sps:$4 sm:$0xff]  }
  0xa4   :  { %1741 = vmatpush1.bf16.msra.mxu0 %v3449_v5  ;;  %1913 = vmatpush1.bf16.msra.mxu1 %v3452_v6  ;;  %v3539_v5 = vld [vmem:[#allocation2 + $0x5c0] ss:$16 sps:$4 sm:$0xff]   ;;  %v3542_v6 = vld [vmem:[#allocation2 + $0x5c8] ss:$16 sps:$4 sm:$0xff]  }
  0xa5   :  { %1753 = vmatprep.subr.bf16.mxu0 %v3457_v7  ;;  %1925 = vmatprep.subr.bf16.mxu1 %v3460_v8  ;;  %v3547_v7 = vld [vmem:[#allocation2 + $0x5e4] ss:$16 sps:$4 sm:$0xff]   ;;  %v3550_v8 = vld [vmem:[#allocation2 + $0x5ec] ss:$16 sps:$4 sm:$0xff]  }
  0xa7   :  { %1743 = vmatmul.mubr.bf16.vlgmr.msra.gmra.mrb[0].mxu0 %v2812_v9  ;;  %1915 = vmatmul.mubr.bf16.vlgmr.msra.gmra.mrb[0].mxu1 %v2812_v9  ;;  %v3545_v9 = vld [vmem:[#allocation2 + $0x5e0] ss:$16 sps:$4 sm:$0xff]  }
  0xa8   :  { %1754 = vmatpush1.bf16.msra.mxu0 %v3455_v10  ;;  %1926 = vmatpush1.bf16.msra.mxu1 %v3458_v11  ;;  %v3548_v10 = vld [vmem:[#allocation2 + $0x5e8] ss:$16 sps:$4 sm:$0xff]   ;;  %v3553_v11 = vld [vmem:[#allocation2 + $0x604] ss:$16 sps:$4 sm:$0xff]  }
  0xa9   :  { %1755 = vmatprep.subr.bf16.mxu0 %v3463_v12  ;;  %1927 = vmatprep.subr.bf16.mxu1 %v3466_v13  ;;  %v3556_v12 = vld [vmem:[#allocation2 + $0x60c] ss:$16 sps:$4 sm:$0xff]   ;;  %v3551_v13 = vld [vmem:[#allocation2 + $0x600] ss:$16 sps:$4 sm:$0xff]  }
  0xaa   :  { %1785 = vmatprep.mubr.bf16.mxu0 %v2815_v16  ;;  %1957 = vmatprep.mubr.bf16.mxu1 %v2815_v16  ;;  %v3554_v16 = vld [vmem:[#allocation2 + $0x608] ss:$16 sps:$4 sm:$0xff]  }
  0xac   :  { %1756 = vmatpush1.bf16.msra.mxu0 %v3461_v17  ;;  %1928 = vmatpush1.bf16.msra.mxu1 %v3464_v18  ;;  %v2814_v17 = vcombine.low %v3920_v14, %v3925_v15  ;;  %v3559_v18 = vld [vmem:[#allocation2 + $0x624] ss:$16 sps:$4 sm:$0xff]  }
  0xad   :  { %1757 = vmatprep.subr.bf16.mxu0 %v3469_v19  ;;  %1929 = vmatprep.subr.bf16.mxu1 %v3472_v20  ;;  %v3934_v19 = vld [vmem:[%s4052_s0 + $0x18] sm:$0xff]  ;;  %v3565_v15 = vld [vmem:[#allocation2 + $0x644] ss:$16 sps:$4 sm:$0xff]  }
  0xae   :  { %v3939_v20 = vld [vmem:[%s4052_s0 + $0x38] sm:$0xff] }
  0xaf   :  { %v2817_v14 = vcombine.high %v3934_v19, %v3939_v20 }
  0xb0   :  { %1758 = vmatpush1.bf16.msra.mxu0 %v3467_v21  ;;  %1930 = vmatpush1.bf16.msra.mxu1 %v3470_v22  ;;  %v3562_v21 = vld [vmem:[#allocation2 + $0x62c] ss:$16 sps:$4 sm:$0xff]   ;;  %v3557_v22 = vld [vmem:[#allocation2 + $0x620] ss:$16 sps:$4 sm:$0xff]  }
  0xb1   :  { %1759 = vmatprep.subr.bf16.mxu0 %v3475_v23  ;;  %1931 = vmatprep.subr.bf16.mxu1 %v3478_v24  ;;  %v3560_v23 = vld [vmem:[#allocation2 + $0x628] ss:$16 sps:$4 sm:$0xff]   ;;  %v3568_v24 = vld [vmem:[#allocation2 + $0x64c] ss:$16 sps:$4 sm:$0xff]  }
  0xb4   :  { %1760 = vmatpush1.bf16.msra.mxu0 %v3473_v25  ;;  %1932 = vmatpush1.bf16.msra.mxu1 %v3476_v26  ;;  %v3563_v25 = vld [vmem:[#allocation2 + $0x640] ss:$16 sps:$4 sm:$0xff]   ;;  %v3566_v26 = vld [vmem:[#allocation2 + $0x648] ss:$16 sps:$4 sm:$0xff]  }
  0xb5   :  { %1761 = vmatprep.subr.bf16.mxu0 %v3481_v27  ;;  %1933 = vmatprep.subr.bf16.mxu1 %v3484_v28  ;;  %v3571_v27 = vld [vmem:[#allocation2 + $0x664] ss:$16 sps:$4 sm:$0xff]   ;;  %v3574_v28 = vld [vmem:[#allocation2 + $0x66c] ss:$16 sps:$4 sm:$0xff]  }
  0xb8   :  { %1762 = vmatpush1.bf16.msra.mxu0 %v3479_v29  ;;  %1934 = vmatpush1.bf16.msra.mxu1 %v3482_v30  ;;  %v3569_v29 = vld [vmem:[#allocation2 + $0x660] ss:$16 sps:$4 sm:$0xff]   ;;  %v3572_v30 = vld [vmem:[#allocation2 + $0x668] ss:$16 sps:$4 sm:$0xff]  }
  0xb9   :  { %1763 = vmatprep.subr.bf16.mxu0 %v3487_v31  ;;  %1935 = vmatprep.subr.bf16.mxu1 %v3490_v32  ;;  %v3577_v31 = vld [vmem:[#allocation2 + $0x684] ss:$16 sps:$4 sm:$0xff]   ;;  %v3580_v32 = vld [vmem:[#allocation2 + $0x68c] ss:$16 sps:$4 sm:$0xff]  }
  0xbc   :  { %1764 = vmatpush1.bf16.msra.mxu0 %v3485_v33  ;;  %1936 = vmatpush1.bf16.msra.mxu1 %v3488_v34  ;;  %v3575_v33 = vld [vmem:[#allocation2 + $0x680] ss:$16 sps:$4 sm:$0xff]   ;;  %v3578_v34 = vld [vmem:[#allocation2 + $0x688] ss:$16 sps:$4 sm:$0xff]  }
  0xbd   :  { %1765 = vmatprep.subr.bf16.mxu0 %v3493_v35  ;;  %1937 = vmatprep.subr.bf16.mxu1 %v3496_v36  ;;  %v3583_v35 = vld [vmem:[#allocation2 + $0x6a4] ss:$16 sps:$4 sm:$0xff]   ;;  %v3586_v36 = vld [vmem:[#allocation2 + $0x6ac] ss:$16 sps:$4 sm:$0xff]  }
  0xc0   :  { %1766 = vmatpush1.bf16.msra.mxu0 %v3491_v37  ;;  %1938 = vmatpush1.bf16.msra.mxu1 %v3494_v38  ;;  %v3581_v37 = vld [vmem:[#allocation2 + $0x6a0] ss:$16 sps:$4 sm:$0xff]   ;;  %v3584_v38 = vld [vmem:[#allocation2 + $0x6a8] ss:$16 sps:$4 sm:$0xff]  }
  0xc1   :  { %1767 = vmatprep.subr.bf16.mxu0 %v3499_v39  ;;  %1939 = vmatprep.subr.bf16.mxu1 %v3502_v40  ;;  %v3589_v39 = vld [vmem:[#allocation2 + $0x6c4] ss:$16 sps:$4 sm:$0xff]   ;;  %v3592_v40 = vld [vmem:[#allocation2 + $0x6cc] ss:$16 sps:$4 sm:$0xff]  }
  0xc4   :  { %1768 = vmatpush1.bf16.msra.mxu0 %v3497_v41  ;;  %1940 = vmatpush1.bf16.msra.mxu1 %v3500_v42  ;;  %v3587_v41 = vld [vmem:[#allocation2 + $0x6c0] ss:$16 sps:$4 sm:$0xff]   ;;  %v3590_v42 = vld [vmem:[#allocation2 + $0x6c8] ss:$16 sps:$4 sm:$0xff]  }
  0xc5   :  { %1769 = vmatprep.subr.bf16.mxu0 %v3505_v43  ;;  %1941 = vmatprep.subr.bf16.mxu1 %v3508_v44  ;;  %v3595_v43 = vld [vmem:[#allocation2 + $0x6e4] ss:$16 sps:$4 sm:$0xff]   ;;  %v3598_v44 = vld [vmem:[#allocation2 + $0x6ec] ss:$16 sps:$4 sm:$0xff]  }
  0xc8   :  { %1770 = vmatpush1.bf16.msra.mxu0 %v3503_v45  ;;  %1942 = vmatpush1.bf16.msra.mxu1 %v3506_v46  ;;  %v3593_v45 = vld [vmem:[#allocation2 + $0x6e0] ss:$16 sps:$4 sm:$0xff]   ;;  %v3596_v46 = vld [vmem:[#allocation2 + $0x6e8] ss:$16 sps:$4 sm:$0xff]  }
  0xc9   :  { %1771 = vmatprep.subr.bf16.mxu0 %v3511_v47  ;;  %1943 = vmatprep.subr.bf16.mxu1 %v3514_v48  ;;  %v3601_v47 = vld [vmem:[#allocation2 + $0x704] ss:$16 sps:$4 sm:$0xff]   ;;  %v3604_v48 = vld [vmem:[#allocation2 + $0x70c] ss:$16 sps:$4 sm:$0xff]  }
  0xcc   :  { %1772 = vmatpush1.bf16.msra.mxu0 %v3509_v49  ;;  %1944 = vmatpush1.bf16.msra.mxu1 %v3512_v50  ;;  %v3599_v49 = vld [vmem:[#allocation2 + $0x700] ss:$16 sps:$4 sm:$0xff]   ;;  %v3602_v50 = vld [vmem:[#allocation2 + $0x708] ss:$16 sps:$4 sm:$0xff]  }
  0xcd   :  { %1773 = vmatprep.subr.bf16.mxu0 %v3517_v51  ;;  %1945 = vmatprep.subr.bf16.mxu1 %v3520_v52  ;;  %v3607_v51 = vld [vmem:[#allocation2 + $0x724] ss:$16 sps:$4 sm:$0xff]   ;;  %v3610_v52 = vld [vmem:[#allocation2 + $0x72c] ss:$16 sps:$4 sm:$0xff]  }
  0xd0   :  { %1774 = vmatpush1.bf16.msra.mxu0 %v3515_v53  ;;  %1946 = vmatpush1.bf16.msra.mxu1 %v3518_v54  ;;  %v3605_v53 = vld [vmem:[#allocation2 + $0x720] ss:$16 sps:$4 sm:$0xff]   ;;  %v3608_v54 = vld [vmem:[#allocation2 + $0x728] ss:$16 sps:$4 sm:$0xff]  }
  0xd1   :  { %1775 = vmatprep.subr.bf16.mxu0 %v3523_v55  ;;  %1947 = vmatprep.subr.bf16.mxu1 %v3526_v56  ;;  %v3613_v55 = vld [vmem:[#allocation2 + $0x744] ss:$16 sps:$4 sm:$0xff]   ;;  %v3616_v56 = vld [vmem:[#allocation2 + $0x74c] ss:$16 sps:$4 sm:$0xff]  }
  0xd4   :  { %1776 = vmatpush1.bf16.msra.mxu0 %v3521_v57  ;;  %1948 = vmatpush1.bf16.msra.mxu1 %v3524_v58  ;;  %v3611_v57 = vld [vmem:[#allocation2 + $0x740] ss:$16 sps:$4 sm:$0xff]   ;;  %v3614_v58 = vld [vmem:[#allocation2 + $0x748] ss:$16 sps:$4 sm:$0xff]  }
  0xd5   :  { %1777 = vmatprep.subr.bf16.mxu0 %v3529_v59  ;;  %1949 = vmatprep.subr.bf16.mxu1 %v3532_v60  ;;  %v3619_v59 = vld [vmem:[#allocation2 + $0x764] ss:$16 sps:$4 sm:$0xff]   ;;  %v3622_v60 = vld [vmem:[#allocation2 + $0x76c] ss:$16 sps:$4 sm:$0xff]  }
  0xd8   :  { %1778 = vmatpush1.bf16.msra.mxu0 %v3527_v61  ;;  %1950 = vmatpush1.bf16.msra.mxu1 %v3530_v62  ;;  %v3617_v61 = vld [vmem:[#allocation2 + $0x760] ss:$16 sps:$4 sm:$0xff]   ;;  %v3620_v62 = vld [vmem:[#allocation2 + $0x768] ss:$16 sps:$4 sm:$0xff]  }
  0xd9   :  { %1779 = vmatprep.subr.bf16.mxu0 %v3535_v63  ;;  %1951 = vmatprep.subr.bf16.mxu1 %v3538_v0  ;;  %v3625_v63 = vld [vmem:[#allocation2 + $0x784] ss:$16 sps:$4 sm:$0xff]   ;;  %v3628_v0 = vld [vmem:[#allocation2 + $0x78c] ss:$16 sps:$4 sm:$0xff]  }
  0xdc   :  { %1780 = vmatpush1.bf16.msra.mxu0 %v3533_v1  ;;  %1952 = vmatpush1.bf16.msra.mxu1 %v3536_v2  ;;  %v3623_v1 = vld [vmem:[#allocation2 + $0x780] ss:$16 sps:$4 sm:$0xff]   ;;  %v3626_v2 = vld [vmem:[#allocation2 + $0x788] ss:$16 sps:$4 sm:$0xff]  }
  0xdd   :  { %1781 = vmatprep.subr.bf16.mxu0 %v3541_v3  ;;  %1953 = vmatprep.subr.bf16.mxu1 %v3544_v4  ;;  %v3631_v3 = vld [vmem:[#allocation2 + $0x7a4] ss:$16 sps:$4 sm:$0xff]   ;;  %v3634_v4 = vld [vmem:[#allocation2 + $0x7ac] ss:$16 sps:$4 sm:$0xff]  }
  0xe0   :  { %1782 = vmatpush1.bf16.msra.mxu0 %v3539_v5  ;;  %1954 = vmatpush1.bf16.msra.mxu1 %v3542_v6  ;;  %v3629_v5 = vld [vmem:[#allocation2 + $0x7a0] ss:$16 sps:$4 sm:$0xff]   ;;  %v3632_v6 = vld [vmem:[#allocation2 + $0x7a8] ss:$16 sps:$4 sm:$0xff]  }
  0xe1   :  { %1783 = vmatprep.subr.bf16.mxu0 %v3547_v7  ;;  %1955 = vmatprep.subr.bf16.mxu1 %v3550_v8  ;;  %v3637_v7 = vld [vmem:[#allocation2 + $0x7c4] ss:$16 sps:$4 sm:$0xff]   ;;  %v3640_v8 = vld [vmem:[#allocation2 + $0x7cc] ss:$16 sps:$4 sm:$0xff]  }
  0xe4   :  { %1784 = vmatpush1.bf16.msra.mxu0 %v3545_v9  ;;  %1956 = vmatpush1.bf16.msra.mxu1 %v3548_v10  ;;  %v3635_v9 = vld [vmem:[#allocation2 + $0x7c0] ss:$16 sps:$4 sm:$0xff]   ;;  %v3638_v10 = vld [vmem:[#allocation2 + $0x7c8] ss:$16 sps:$4 sm:$0xff]  }
  0xe5   :  { %1796 = vmatprep.subr.bf16.mxu0 %v3553_v11  ;;  %1968 = vmatprep.subr.bf16.mxu1 %v3556_v12  ;;  %v3643_v11 = vld [vmem:[#allocation2 + $0x7e4] ss:$16 sps:$4 sm:$0xff]   ;;  %v3646_v12 = vld [vmem:[#allocation2 + $0x7ec] ss:$16 sps:$4 sm:$0xff]  }
  0xe7   :  { %1786 = vmatmul.mubr.bf16.vlgmr.msra.gmra.mrb[0].mxu0 %v2814_v17  ;;  %1958 = vmatmul.mubr.bf16.vlgmr.msra.gmra.mrb[0].mxu1 %v2814_v17  ;;  %v3649_v17 = vld [vmem:[#allocation4 + $0x4] ss:$8 sps:$4 sm:$0xff]  }
  0xe8   :  { %1797 = vmatpush1.bf16.msra.mxu0 %v3551_v13  ;;  %1969 = vmatpush1.bf16.msra.mxu1 %v3554_v16  ;;  %v3641_v13 = vld [vmem:[#allocation2 + $0x7e0] ss:$16 sps:$4 sm:$0xff]   ;;  %v3644_v16 = vld [vmem:[#allocation2 + $0x7e8] ss:$16 sps:$4 sm:$0xff]  }
  0xe9   :  { %1798 = vmatprep.subr.bf16.mxu0 %v3559_v18  ;;  %1970 = vmatprep.subr.bf16.mxu1 %v3562_v21  ;;  %v2816_v18 = vcombine.low %v3934_v19, %v3939_v20  ;;  %v3647_v21 = vld [vmem:[#allocation4] ss:$8 sps:$4 sm:$0xff]   ;;  %v3664_v20 = vld [vmem:[#allocation4 + $0x54] ss:$8 sps:$4 sm:$0xff]  }
  0xea   :  { %1828 = vmatprep.mubr.bf16.mxu0 %v2817_v14  ;;  %2000 = vmatprep.mubr.bf16.mxu1 %v2817_v14  ;;  %v3655_v14 = vld [vmem:[#allocation4 + $0x24] ss:$8 sps:$4 sm:$0xff]   ;;  %v3659_v19 = vld [vmem:[#allocation4 + $0x40] ss:$8 sps:$4 sm:$0xff]  }
  0xec   :  { %1799 = vmatpush1.bf16.msra.mxu0 %v3557_v22  ;;  %1971 = vmatpush1.bf16.msra.mxu1 %v3560_v23  ;;  %v3652_v22 = vld [vmem:[#allocation4 + $0x14] ss:$8 sps:$4 sm:$0xff]   ;;  %v3650_v23 = vld [vmem:[#allocation4 + $0x10] ss:$8 sps:$4 sm:$0xff]  }
  0xed   :  { %1800 = vmatprep.subr.bf16.mxu0 %v3565_v15  ;;  %1972 = vmatprep.subr.bf16.mxu1 %v3568_v24  ;;  %v3653_v15 = vld [vmem:[#allocation4 + $0x20] ss:$8 sps:$4 sm:$0xff]   ;;  %v3658_v24 = vld [vmem:[#allocation4 + $0x34] ss:$8 sps:$4 sm:$0xff]  }
  0xf0   :  { %1801 = vmatpush1.bf16.msra.mxu0 %v3563_v25  ;;  %1973 = vmatpush1.bf16.msra.mxu1 %v3566_v26  ;;  %v3656_v25 = vld [vmem:[#allocation4 + $0x30] ss:$8 sps:$4 sm:$0xff]   ;;  %v3661_v26 = vld [vmem:[#allocation4 + $0x44] ss:$8 sps:$4 sm:$0xff]  }
  0xf1   :  { %1802 = vmatprep.subr.bf16.mxu0 %v3571_v27  ;;  %1974 = vmatprep.subr.bf16.mxu1 %v3574_v28  ;;  %v3662_v27 = vld [vmem:[#allocation4 + $0x50] ss:$8 sps:$4 sm:$0xff]   ;;  %v3667_v28 = vld [vmem:[#allocation4 + $0x64] ss:$8 sps:$4 sm:$0xff]  }
  0xf4   :  { %1803 = vmatpush1.bf16.msra.mxu0 %v3569_v29  ;;  %1975 = vmatpush1.bf16.msra.mxu1 %v3572_v30  ;;  %v3665_v29 = vld [vmem:[#allocation4 + $0x60] ss:$8 sps:$4 sm:$0xff]   ;;  %v3670_v30 = vld [vmem:[#allocation4 + $0x74] ss:$8 sps:$4 sm:$0xff]  }
  0xf5   :  { %1804 = vmatprep.subr.bf16.mxu0 %v3577_v31  ;;  %1976 = vmatprep.subr.bf16.mxu1 %v3580_v32  ;;  %v3668_v31 = vld [vmem:[#allocation4 + $0x70] ss:$8 sps:$4 sm:$0xff]   ;;  %v3673_v32 = vld [vmem:[#allocation4 + $0x84] ss:$8 sps:$4 sm:$0xff]  }
  0xf8   :  { %1805 = vmatpush1.bf16.msra.mxu0 %v3575_v33  ;;  %1977 = vmatpush1.bf16.msra.mxu1 %v3578_v34  ;;  %v3671_v33 = vld [vmem:[#allocation4 + $0x80] ss:$8 sps:$4 sm:$0xff]   ;;  %v3676_v34 = vld [vmem:[#allocation4 + $0x94] ss:$8 sps:$4 sm:$0xff]  }
  0xf9   :  { %1806 = vmatprep.subr.bf16.mxu0 %v3583_v35  ;;  %1978 = vmatprep.subr.bf16.mxu1 %v3586_v36  ;;  %v3674_v35 = vld [vmem:[#allocation4 + $0x90] ss:$8 sps:$4 sm:$0xff]   ;;  %v3679_v36 = vld [vmem:[#allocation4 + $0xa4] ss:$8 sps:$4 sm:$0xff]  }
  0xfc   :  { %1807 = vmatpush1.bf16.msra.mxu0 %v3581_v37  ;;  %1979 = vmatpush1.bf16.msra.mxu1 %v3584_v38  ;;  %v3677_v37 = vld [vmem:[#allocation4 + $0xa0] ss:$8 sps:$4 sm:$0xff]   ;;  %v3682_v38 = vld [vmem:[#allocation4 + $0xb4] ss:$8 sps:$4 sm:$0xff]  }
  0xfd   :  { %1808 = vmatprep.subr.bf16.mxu0 %v3589_v39  ;;  %1980 = vmatprep.subr.bf16.mxu1 %v3592_v40  ;;  %v3680_v39 = vld [vmem:[#allocation4 + $0xb0] ss:$8 sps:$4 sm:$0xff]   ;;  %v3685_v40 = vld [vmem:[#allocation4 + $0xc4] ss:$8 sps:$4 sm:$0xff]  }
 0x100   :  { %1809 = vmatpush1.bf16.msra.mxu0 %v3587_v41  ;;  %1981 = vmatpush1.bf16.msra.mxu1 %v3590_v42  ;;  %v3683_v41 = vld [vmem:[#allocation4 + $0xc0] ss:$8 sps:$4 sm:$0xff]   ;;  %v3688_v42 = vld [vmem:[#allocation4 + $0xd4] ss:$8 sps:$4 sm:$0xff]  }
 0x101   :  { %1810 = vmatprep.subr.bf16.mxu0 %v3595_v43  ;;  %1982 = vmatprep.subr.bf16.mxu1 %v3598_v44  ;;  %v3686_v43 = vld [vmem:[#allocation4 + $0xd0] ss:$8 sps:$4 sm:$0xff]   ;;  %v3691_v44 = vld [vmem:[#allocation4 + $0xe4] ss:$8 sps:$4 sm:$0xff]  }
 0x104   :  { %1811 = vmatpush1.bf16.msra.mxu0 %v3593_v45  ;;  %1983 = vmatpush1.bf16.msra.mxu1 %v3596_v46  ;;  %v3689_v45 = vld [vmem:[#allocation4 + $0xe0] ss:$8 sps:$4 sm:$0xff]   ;;  %v3694_v46 = vld [vmem:[#allocation4 + $0xf4] ss:$8 sps:$4 sm:$0xff]  }
 0x105   :  { %1812 = vmatprep.subr.bf16.mxu0 %v3601_v47  ;;  %1984 = vmatprep.subr.bf16.mxu1 %v3604_v48  ;;  %v3692_v47 = vld [vmem:[#allocation4 + $0xf0] ss:$8 sps:$4 sm:$0xff]   ;;  %v3697_v48 = vld [vmem:[#allocation4 + $0x104] ss:$8 sps:$4 sm:$0xff]  }
 0x108   :  { %1813 = vmatpush1.bf16.msra.mxu0 %v3599_v49  ;;  %1985 = vmatpush1.bf16.msra.mxu1 %v3602_v50  ;;  %v3743_v49 = vld [vmem:[%s4057_s5 + $0x40] sm:$0xff]  }
 0x109   :  { %1814 = vmatprep.subr.bf16.mxu0 %v3607_v51  ;;  %1986 = vmatprep.subr.bf16.mxu1 %v3610_v52  ;;  %v3744_v50 = vld [vmem:[%s4057_s5] sm:$0xff]   ;;  %v3745_v51 = vld [vmem:[%s4057_s5 + $0x48] sm:$0xff]  }
 0x10a   :  { %v3746_v52 = vld [vmem:[%s4057_s5 + $0x8] sm:$0xff]  }
 0x10c   :  { %1815 = vmatpush1.bf16.msra.mxu0 %v3605_v53  ;;  %1987 = vmatpush1.bf16.msra.mxu1 %v3608_v54  ;;  %v3747_v53 = vld [vmem:[%s4057_s5 + $0x50] sm:$0xff]  }
 0x10d   :  { %1816 = vmatprep.subr.bf16.mxu0 %v3613_v55  ;;  %1988 = vmatprep.subr.bf16.mxu1 %v3616_v56  ;;  %v3748_v54 = vld [vmem:[%s4057_s5 + $0x10] sm:$0xff]   ;;  %v3749_v55 = vld [vmem:[%s4057_s5 + $0x58] sm:$0xff]  }
 0x10e   :  { %v3750_v56 = vld [vmem:[%s4057_s5 + $0x18] sm:$0xff]  }
 0x110   :  { %1817 = vmatpush1.bf16.msra.mxu0 %v3611_v57  ;;  %1989 = vmatpush1.bf16.msra.mxu1 %v3614_v58  ;;  %v3751_v57 = vld [vmem:[%s4057_s5 + $0x60] sm:$0xff]  }
 0x111   :  { %1818 = vmatprep.subr.bf16.mxu0 %v3619_v59  ;;  %1990 = vmatprep.subr.bf16.mxu1 %v3622_v60  ;;  %v3752_v58 = vld [vmem:[%s4057_s5 + $0x20] sm:$0xff]   ;;  %v3753_v59 = vld [vmem:[%s4057_s5 + $0x68] sm:$0xff]   ;;  %v327_v60 = vlaneseq }
 0x114   :  { %1819 = vmatpush1.bf16.msra.mxu0 %v3617_v61  ;;  %1991 = vmatpush1.bf16.msra.mxu1 %v3620_v62  ;;  %v3978_v61 = vshrl.u32 %v327_v60, 7  ;;  %v3736_v60 = vld [vmem:[#allocation4 + $0x1d4] ss:$8 sps:$4 sm:$0xff]  }
 0x115   :  { %1820 = vmatprep.subr.bf16.mxu0 %v3625_v63  ;;  %1992 = vmatprep.subr.bf16.mxu1 %v3628_v0  ;;  %v325_v0 = vld [vmem:[%s4054_s2] sm:$0xf] }
 0x116   :  { %v329_v62 = vsub.s32 0, %v3978_v61  ;;  %v337_v63 = vsub.s32 2, %v3978_v61 }
 0x118   :  { %1821 = vmatpush1.bf16.msra.mxu0 %v3623_v1  ;;  %1993 = vmatpush1.bf16.msra.mxu1 %v3626_v2  ;;  %v333_v1 = vsub.s32 1, %v3978_v61  ;;  %v341_v2 = vsub.s32 3, %v3978_v61  ;;  %v3760_v61 = vld [vmem:[%s4059_s7 + $0x8] sm:$0xff]  }
 0x119   :  { %1822 = vmatprep.subr.bf16.mxu0 %v3631_v3  ;;  %1994 = vmatprep.subr.bf16.mxu1 %v3634_v4  ;;  %v330_v3 = vrot.slane %v325_v0, %v329_v62  ;;  %v338_v4 = vrot.slane %v325_v0, %v337_v63  ;;  %v3734_v63 = vld [vmem:[#allocation4 + $0x1d0] ss:$8 sps:$4 sm:$0xff]  }
 0x11c   :  { %1823 = vmatpush1.bf16.msra.mxu0 %v3629_v5  ;;  %1995 = vmatpush1.bf16.msra.mxu1 %v3632_v6  ;;  %v334_v5 = vrot.slane %v325_v0, %v333_v1  ;;  %v342_v6 = vrot.slane %v325_v0, %v341_v2  ;;  %v3739_v0 = vld [vmem:[#allocation4 + $0x1e4] ss:$8 sps:$4 sm:$0xff]   ;;  %v3737_v2 = vld [vmem:[#allocation4 + $0x1e0] ss:$8 sps:$4 sm:$0xff]  }
 0x11d   :  { %1824 = vmatprep.subr.bf16.mxu0 %v3637_v7  ;;  %1996 = vmatprep.subr.bf16.mxu1 %v3640_v8 }
 0x120   :  { %1825 = vmatpush1.bf16.msra.mxu0 %v3635_v9  ;;  %1997 = vmatpush1.bf16.msra.mxu1 %v3638_v10 }
 0x121   :  { %1826 = vmatprep.subr.bf16.mxu0 %v3643_v11  ;;  %1998 = vmatprep.subr.bf16.mxu1 %v3646_v12 }
 0x124   :  { %1827 = vmatpush1.bf16.msra.mxu0 %v3641_v13  ;;  %1999 = vmatpush1.bf16.msra.mxu1 %v3644_v16 }
 0x125   :  { %2419 = vmatprep.subr.bf16.mxu0 %v3649_v17  ;;  %3164 = vmatprep.subr.bf16.mxu1 %v3743_v49  ;;  %v3716_v49 = vld [vmem:[#allocation4 + $0x170] ss:$8 sps:$4 sm:$0xff]  }
 0x127   :  { %1829 = vmatmul.mubr.bf16.vlgmr.msra.gmra.mrb[0].mxu0 %v2816_v18  ;;  %2001 = vmatmul.mubr.bf16.vlgmr.msra.gmra.mrb[0].mxu1 %v2816_v18 }
 0x128   :  { %2420 = vmatpush1.bf16.msra.mxu0 %v3647_v21  ;;  %3165 = vmatpush3.bf16.msra.mxu1 %v3744_v50  ;;  %v3721_v50 = vld [vmem:[#allocation4 + $0x184] ss:$8 sps:$4 sm:$0xff]  }
 0x129   :  { %2421 = vmatprep.subr.bf16.mxu0 %v3652_v22  ;;  %3166 = vmatprep.subr.bf16.mxu1 %v3745_v51  ;;  %v3719_v51 = vld [vmem:[#allocation4 + $0x180] ss:$8 sps:$4 sm:$0xff]  }
 0x12c   :  { %2422 = vmatpush1.bf16.msra.mxu0 %v3650_v23  ;;  %3167 = vmatpush3.bf16.msra.mxu1 %v3746_v52  ;;  %v3724_v52 = vld [vmem:[#allocation4 + $0x194] ss:$8 sps:$4 sm:$0xff]  }
 0x12d   :  { %2423 = vmatprep.subr.bf16.mxu0 %v3655_v14  ;;  %3168 = vmatprep.subr.bf16.mxu1 %v3747_v53  ;;  %v3722_v53 = vld [vmem:[#allocation4 + $0x190] ss:$8 sps:$4 sm:$0xff]  }
 0x130   :  { %2424 = vmatpush1.bf16.msra.mxu0 %v3653_v15  ;;  %3169 = vmatpush3.bf16.msra.mxu1 %v3748_v54  ;;  %v3727_v54 = vld [vmem:[#allocation4 + $0x1a4] ss:$8 sps:$4 sm:$0xff]  }
 0x131   :  { %2425 = vmatprep.subr.bf16.mxu0 %v3658_v24  ;;  %3170 = vmatprep.subr.bf16.mxu1 %v3749_v55  ;;  %v3725_v55 = vld [vmem:[#allocation4 + $0x1a0] ss:$8 sps:$4 sm:$0xff]  }
 0x134   :  { %2426 = vmatpush1.bf16.msra.mxu0 %v3656_v25  ;;  %3171 = vmatpush3.bf16.msra.mxu1 %v3750_v56  ;;  %v3730_v56 = vld [vmem:[#allocation4 + $0x1b4] ss:$8 sps:$4 sm:$0xff]  }
 0x135   :  { %2427 = vmatprep.subr.bf16.mxu0 %v3661_v26  ;;  %3172 = vmatprep.subr.bf16.mxu1 %v3751_v57  ;;  %v3728_v57 = vld [vmem:[#allocation4 + $0x1b0] ss:$8 sps:$4 sm:$0xff]  }
 0x138   :  { %2428 = vmatpush1.bf16.msra.mxu0 %v3659_v19  ;;  %3173 = vmatpush3.bf16.msra.mxu1 %v3752_v58  ;;  %v3733_v58 = vld [vmem:[#allocation4 + $0x1c4] ss:$8 sps:$4 sm:$0xff]  }
 0x139   :  { %2429 = vmatprep.subr.bf16.mxu0 %v3664_v20  ;;  %3174 = vmatprep.subr.bf16.mxu1 %v3753_v59  ;;  %v3731_v59 = vld [vmem:[#allocation4 + $0x1c0] ss:$8 sps:$4 sm:$0xff]  }
 0x13c   :  { %2430 = vmatpush1.bf16.msra.mxu0 %v3662_v27 }
 0x13d   :  { %2431 = vmatprep.subr.bf16.mxu0 %v3667_v28 }
 0x140   :  { %2432 = vmatpush1.bf16.msra.mxu0 %v3665_v29 }
 0x141   :  { %2433 = vmatprep.subr.bf16.mxu0 %v3670_v30 }
 0x144   :  { %2434 = vmatpush1.bf16.msra.mxu0 %v3668_v31 }
 0x145   :  { %2435 = vmatprep.subr.bf16.mxu0 %v3673_v32 }
 0x148   :  { %2436 = vmatpush1.bf16.msra.mxu0 %v3671_v33 }
 0x149   :  { %2437 = vmatprep.subr.bf16.mxu0 %v3676_v34 }
 0x14c   :  { %2438 = vmatpush1.bf16.msra.mxu0 %v3674_v35  ;;  %v3695_v35 = vld [vmem:[#allocation4 + $0x100] ss:$8 sps:$4 sm:$0xff]  }
 0x14d   :  { %2439 = vmatprep.subr.bf16.mxu0 %v3679_v36  ;;  %v3700_v36 = vld [vmem:[#allocation4 + $0x114] ss:$8 sps:$4 sm:$0xff]  }
 0x150   :  { %2440 = vmatpush1.bf16.msra.mxu0 %v3677_v37  ;;  %v3698_v37 = vld [vmem:[#allocation4 + $0x110] ss:$8 sps:$4 sm:$0xff]  }
 0x151   :  { %2441 = vmatprep.subr.bf16.mxu0 %v3682_v38  ;;  %v3703_v38 = vld [vmem:[#allocation4 + $0x124] ss:$8 sps:$4 sm:$0xff]  }
 0x154   :  { %2442 = vmatpush1.bf16.msra.mxu0 %v3680_v39  ;;  %v3701_v39 = vld [vmem:[#allocation4 + $0x120] ss:$8 sps:$4 sm:$0xff]  }
 0x155   :  { %2443 = vmatprep.subr.bf16.mxu0 %v3685_v40  ;;  %v3706_v40 = vld [vmem:[#allocation4 + $0x134] ss:$8 sps:$4 sm:$0xff]  }
 0x158   :  { %2444 = vmatpush1.bf16.msra.mxu0 %v3683_v41  ;;  %v3704_v41 = vld [vmem:[#allocation4 + $0x130] ss:$8 sps:$4 sm:$0xff]  }
 0x159   :  { %2445 = vmatprep.subr.bf16.mxu0 %v3688_v42  ;;  %v3709_v42 = vld [vmem:[#allocation4 + $0x144] ss:$8 sps:$4 sm:$0xff]  }
 0x15c   :  { %2446 = vmatpush1.bf16.msra.mxu0 %v3686_v43  ;;  %v3707_v43 = vld [vmem:[#allocation4 + $0x140] ss:$8 sps:$4 sm:$0xff]  }
 0x15d   :  { %2447 = vmatprep.subr.bf16.mxu0 %v3691_v44  ;;  %v3712_v44 = vld [vmem:[#allocation4 + $0x154] ss:$8 sps:$4 sm:$0xff]  }
 0x160   :  { %2448 = vmatpush1.bf16.msra.mxu0 %v3689_v45  ;;  %v3710_v45 = vld [vmem:[#allocation4 + $0x150] ss:$8 sps:$4 sm:$0xff]  }
 0x161   :  { %2449 = vmatprep.subr.bf16.mxu0 %v3694_v46  ;;  %v3715_v46 = vld [vmem:[#allocation4 + $0x164] ss:$8 sps:$4 sm:$0xff]  }
 0x164   :  { %2450 = vmatpush1.bf16.msra.mxu0 %v3692_v47  ;;  %v3713_v47 = vld [vmem:[#allocation4 + $0x160] ss:$8 sps:$4 sm:$0xff]  }
 0x165   :  { %2462 = vmatprep.subr.bf16.mxu0 %v3697_v48  ;;  %v3718_v48 = vld [vmem:[#allocation4 + $0x174] ss:$8 sps:$4 sm:$0xff]  }
 0x1fa   :  { %v1830_v7 = vpop.f32.mrb[0].mxu0  ;;  %v2002_v8 = vpop.f32.mrb[0].mxu1 }
 0x1fb   :  { %v3215_v9 = vadd.f32 %v1830_v7, %v330_v3  ;;  %v3219_v10 = vadd.f32 %v2002_v8, %v338_v4  ;;  %v1832_v11 = vpop.f32.mrb[1].mxu0  ;;  %v2004_v12 = vpop.f32.mrb[1].mxu1  ;;  %v3756_v7 = vld [vmem:[%s4057_s5 + $0x30] sm:$0xff]   ;;  %v3757_v8 = vld [vmem:[%s4057_s5 + $0x78] sm:$0xff]  }
 0x1fc   :  { %v3216_v13 = vadd.f32 %v1832_v11, %v334_v5  ;;  %v3220_v16 = vadd.f32 %v2004_v12, %v342_v6  ;;  %v1834_v17 = vpop.f32.mrb[2].mxu0  ;;  %v2006_v18 = vpop.f32.mrb[2].mxu1  ;;  %v2087_v11 = vld [vmem:[%s4056_s4] sm:$0x3] }
 0x1fd   :  { %v3217_v21 = vadd.f32 %v1834_v17, %v330_v3  ;;  %v3221_v22 = vadd.f32 %v2006_v18, %v338_v4  ;;  %v1836_v23 = vpop.f32.mrb[3].mxu0  ;;  %v2008_v14 = vpop.f32.mrb[3].mxu1  ;;  %v2011_v25 = vmax.f32 %v3215_v9, 0.0  ;;  %v2013_v26 = vmax.f32 %v3219_v10, 0.0  ;;  %v3742_v3 = vld [vmem:[#allocation4 + $0x1f4] ss:$8 sps:$4 sm:$0xff]  }
 0x1fe   :  { %v3218_v15 = vadd.f32 %v1836_v23, %v334_v5  ;;  %v3222_v24 = vadd.f32 %v2008_v14, %v342_v6  ;;  %v2012_v27 = vmax.f32 %v3216_v13, 0.0  ;;  %v2014_v28 = vmax.f32 %v3220_v16, 0.0  ;;  %v3740_v4 = vld [vmem:[#allocation4 + $0x1f0] ss:$8 sps:$4 sm:$0xff]   ;;  %v3754_v5 = vld [vmem:[%s4057_s5 + $0x28] sm:$0xff]  }
 0x1ff   :  { %v2015_v19 = vmax.f32 %v3217_v21, 0.0  ;;  %v2017_v20 = vmax.f32 %v3221_v22, 0.0  ;;  %3175 = vmatpush3.bf16.msra.mxu1 %v3754_v5  ;;  %v3755_v6 = vld [vmem:[%s4057_s5 + $0x70] sm:$0xff]   ;;  %v3758_v9 = vld [vmem:[%s4057_s5 + $0x38] sm:$0xff]   ;;  %v3821_v10 = vmov 0.0   ;;  %v2092_v12 = vrot.slane %v2087_v11, %v329_v62  ;;  %v3759_v62 = vld [vmem:[%s4059_s7] sm:$0xff]  }
 0x200   :  { %v2016_v29 = vmax.f32 %v3218_v15, 0.0  ;;  %v2018_v30 = vmax.f32 %v3222_v24, 0.0  ;;  %3176 = vmatprep.subr.bf16.mxu1 %v3755_v6  ;;  %v2096_v13 = vrot.slane %v2087_v11, %v333_v1  ;;  %v3761_v1 = vld [vmem:[%s4059_s7 + $0x10] sm:$0xff]  }
 0x201   :  { %v2019_v31 = vpack.c.bf16 %v2015_v19, %v2011_v25  ;;  %v3991_v32 = vpack.c.bf16 %v2017_v20, %v2013_v26 }
 0x202   :  { %v2020_v33 = vpack.c.bf16 %v2016_v29, %v2012_v27  ;;  %v2022_v34 = vpack.c.bf16 %v2018_v30, %v2014_v28  ;;  %v3762_v28 = vld [vmem:[%s4059_s7 + $0x18] sm:$0xff]   ;;  %v3763_v29 = vld [vmem:[%s4059_s7 + $0x20] sm:$0xff]   ;;  %v3764_v30 = vld [vmem:[%s4059_s7 + $0x28] sm:$0xff]  }
 0x203   :  { %3177 = vmatpush3.bf16.msra.mxu1 %v3756_v7 }
 0x204   :  { %2451 = vmatprep.mubr.bf16.mxu0 %v2020_v33  ;;  %3178 = vmatprep.subr.bf16.mxu1 %v3757_v8 }
 0x205   :  { %2452 = vmatmul.mubr.bf16.vlgmr.msra.gmra.mrb[4].mxu0 %v2019_v31  ;;  %v3765_v31 = vld [vmem:[%s4059_s7 + $0x30] sm:$0xff]  }
 0x206   :  { %2463 = vmatpush1.bf16.msra.mxu0 %v3695_v35  ;;  %2494 = vmatprep.mubr.bf16.mxu0 %v2022_v34  ;;  %v3138_v34 = vld [vmem:[%s4058_s6] ss:$0 sm:$0xff] }
 0x207   :  { %2464 = vmatprep.subr.bf16.mxu0 %v3700_v36  ;;  %3179 = vmatpush3.bf16.msra.mxu1 %v3758_v9 }
 0x208   :  { %3195 = vmatprep.subr.bf16.mxu1 %v3821_v10 }
 0x20a   :  { %2465 = vmatpush1.bf16.msra.mxu0 %v3698_v37 }
 0x20b   :  { %2466 = vmatprep.subr.bf16.mxu0 %v3703_v38 }
 0x20e   :  { %2467 = vmatpush1.bf16.msra.mxu0 %v3701_v39 }
 0x20f   :  { %2468 = vmatprep.subr.bf16.mxu0 %v3706_v40 }
 0x212   :  { %2469 = vmatpush1.bf16.msra.mxu0 %v3704_v41 }
 0x213   :  { %2470 = vmatprep.subr.bf16.mxu0 %v3709_v42 }
 0x216   :  { %2471 = vmatpush1.bf16.msra.mxu0 %v3707_v43 }
 0x217   :  { %2472 = vmatprep.subr.bf16.mxu0 %v3712_v44 }
 0x21a   :  { %2473 = vmatpush1.bf16.msra.mxu0 %v3710_v45  ;;  %v3155_v45 = vld [vmem:[%s4060_s8] ss:$0 sm:$0xff] }
 0x21b   :  { %2474 = vmatprep.subr.bf16.mxu0 %v3715_v46 }
 0x21e   :  { %2475 = vmatpush1.bf16.msra.mxu0 %v3713_v47 }
 0x21f   :  { %2476 = vmatprep.subr.bf16.mxu0 %v3718_v48 }
 0x222   :  { %2477 = vmatpush1.bf16.msra.mxu0 %v3716_v49 }
 0x223   :  { %2478 = vmatprep.subr.bf16.mxu0 %v3721_v50 }
 0x226   :  { %2479 = vmatpush1.bf16.msra.mxu0 %v3719_v51 }
 0x227   :  { %2480 = vmatprep.subr.bf16.mxu0 %v3724_v52 }
 0x22a   :  { %2481 = vmatpush1.bf16.msra.mxu0 %v3722_v53 }
 0x22b   :  { %2482 = vmatprep.subr.bf16.mxu0 %v3727_v54 }
 0x22e   :  { %2483 = vmatpush1.bf16.msra.mxu0 %v3725_v55 }
 0x22f   :  { %2484 = vmatprep.subr.bf16.mxu0 %v3730_v56 }
 0x232   :  { %2485 = vmatpush1.bf16.msra.mxu0 %v3728_v57 }
 0x233   :  { %2486 = vmatprep.subr.bf16.mxu0 %v3733_v58 }
 0x236   :  { %2487 = vmatpush1.bf16.msra.mxu0 %v3731_v59 }
 0x237   :  { %2488 = vmatprep.subr.bf16.mxu0 %v3736_v60 }
 0x23a   :  { %2489 = vmatpush1.bf16.msra.mxu0 %v3734_v63 }
 0x23b   :  { %2490 = vmatprep.subr.bf16.mxu0 %v3739_v0 }
 0x23e   :  { %2491 = vmatpush1.bf16.msra.mxu0 %v3737_v2 }
 0x23f   :  { %2492 = vmatprep.subr.bf16.mxu0 %v3742_v3 }
 0x242   :  { %2493 = vmatpush1.bf16.msra.mxu0 %v3740_v4 }
 0x245   :  { %2495 = vmatmul.mubr.bf16.vlgmr.msra.gmra.mrb[4].mxu0 %v3991_v32  ;;  %v3766_v32 = vld [vmem:[%s4059_s7 + $0x38] sm:$0xff]  }
 0x318   :  { %v2496_v16 = vpop.f32.mrb[4].mxu0 }
 0x319   :  { %v3223_v17 = vadd.f32 %v2496_v16, %v2092_v12  ;;  %v2498_v18 = vpop.f32.mrb[5].mxu0 }
 0x31a   :  { %v3224_v21 = vadd.f32 %v2498_v18, %v2096_v13  ;;  %v2500_v22 = vpop.f32.mrb[6].mxu0 }
 0x31b   :  { %v3225_v23 = vadd.f32 %v2500_v22, %v2092_v12  ;;  %v2502_v14 = vpop.f32.mrb[7].mxu0  ;;  %v2505_v24 = vmax.f32 %v3223_v17, 0.0 }
 0x31c   :  { %v3226_v15 = vadd.f32 %v2502_v14, %v2096_v13  ;;  %v2506_v26 = vmax.f32 %v3224_v21, 0.0 }
 0x31d   :  { %v2507_v25 = vmax.f32 %v3225_v23, 0.0 }
 0x31e   :  { %v2508_v19 = vmax.f32 %v3226_v15, 0.0 }
 0x31f   :  { %v2509_v20 = vpack.c.bf16 %v2507_v25, %v2505_v24 }
 0x320   :  { %v2510_v27 = vpack.c.bf16 %v2508_v19, %v2506_v26 }
 0x322   :  { %2678 = vmatprep.mubr.bf16.mxu1 %v2510_v27 }
 0x323   :  { %2679 = vmatmul.mubr.bf16.vlgmr.msra.gmra.mrb[4].mxu1 %v2509_v20 }
 0x324   :  { %3196 = vmatpush3.bf16.msra.mxu1 %v3759_v62  ;;  %3211 = vmatprep.mubr.msk.bf16.mxu1 %vm3822_vm0, %v3821_v10 }
 0x325   :  { %3197 = vmatprep.subr.bf16.mxu1 %v3821_v10 }
 0x328   :  { %3198 = vmatpush3.bf16.msra.mxu1 %v3760_v61 }
 0x329   :  { %3199 = vmatprep.subr.bf16.mxu1 %v3821_v10 }
 0x32c   :  { %3200 = vmatpush3.bf16.msra.mxu1 %v3761_v1 }
 0x32d   :  { %3201 = vmatprep.subr.bf16.mxu1 %v3821_v10 }
 0x330   :  { %3202 = vmatpush3.bf16.msra.mxu1 %v3762_v28 }
 0x331   :  { %3203 = vmatprep.subr.bf16.mxu1 %v3821_v10 }
 0x334   :  { %3204 = vmatpush3.bf16.msra.mxu1 %v3763_v29 }
 0x335   :  { %3205 = vmatprep.subr.bf16.mxu1 %v3821_v10 }
 0x338   :  { %3206 = vmatpush3.bf16.msra.mxu1 %v3764_v30 }
 0x339   :  { %3207 = vmatprep.subr.bf16.mxu1 %v3821_v10 }
 0x33c   :  { %3208 = vmatpush3.bf16.msra.mxu1 %v3765_v31 }
 0x33d   :  { %3209 = vmatprep.subr.bf16.mxu1 %v3821_v10 }
 0x340   :  { %3210 = vmatpush3.bf16.msra.mxu1 %v3766_v32 }
 0x3f6   :  { %v3180_v33 = vpop.f32.mrb[4].mxu1 }
 0x3f7   :  { %v3181_v35 = vpop.f32.mrb[5].mxu1 }
 0x3f8   :  { %v3182_v36 = vadd.f32 %v3181_v35, %v3180_v33  ;;  %v3183_v37 = vpop.f32.mrb[6].mxu1 }
 0x3f9   :  { %v3184_v38 = vpop.f32.mrb[7].mxu1 }
 0x3fa   :  { %v2681_v39 = vadd.f32 %v3182_v36, %v3138_v34  ;;  %v3185_v40 = vadd.f32 %v3184_v38, %v3183_v37 }
 0x3fc   :  { %v2684_v41 = vadd.f32 %v3185_v40, %v3138_v34  ;;  %v2687_v42 = vmax.f32 %v2681_v39, 0.0 }
 0x3fe   :  { %v2688_v43 = vmax.f32 %v2684_v41, 0.0 }
 0x400   :  { %v2689_v44 = vpack.c.bf16 %v2688_v43, %v2687_v42 }
 0x402   :  { %3212 = vmatmul.mubr.bf16.vlgmr.msra.gmra.mrb[8].mxu1 %v2689_v44 }
 0x4d5   :  { %v2795_v46 = vpop.f32.mrb[8].mxu1 }
 0x4d6   :  { %v2796_v47 = vadd.f32 %v3155_v45, %v2795_v46  ;;  %v3213_v48 = vpop.f32.mrb[9].mxu1 }
 0x4d7   :  { %v2798_v49 = vpop.f32.mrb[10].mxu1 }
 0x4d8   :  { %2802 = vst [vmem:[%s4061_s9] sm:$0xff] %v2796_v47  ;;  %v2799_v50 = vadd.f32 %v3155_v45, %v2798_v49  ;;  %v3214_v51 = vpop.f32.mrb[11].mxu1 }
 0x4da   :  { %2803 = vst [vmem:[%s4061_s9 + $0x8] sm:$0xff] %v2799_v50 }
 0x4db   :  { %2808 = vsyncpa [#allocation3], 1 }
 0x4dc   :  { %2809 = vsyncpa [#allocation5], 1 }

</bundles_post_ra>
